<compile_context>
chip_gen: v7x
topology: tpu7x:2x2x1
jax: 0.10.0
libtpu: 0.0.40
codegen_flags: <defaults>
</compile_context>

<pallas_src>
import numpy as np
import jax
import jax.numpy as jnp
from jax.experimental import pallas as pl
from jax.experimental.pallas import tpu as pltpu

# ----------------------------- sizes (small test config) -----------------------------
B = 2          # batch
T = 8          # stroke sequence length
H = 32         # LSTM hidden size (PyTorch default 256; scaled down)
CNN_H = 16     # stand-in CNN feature size
IMG = 16       # image spatial size
NCLS = 25      # classifier outputs
OUT_PAD = 128  # lane-dense padded output width
K = 5          # Conv1d kernel size
PAD = (K - 1) // 2


# ----------------------------- single fused kernel -----------------------------
def _fused_kernel(x_ref, pooled_ref, mask_ref, wpre_ref, lstm_ref, ha_ref, hb_ref, out_ref):
    f32 = jnp.float32
    bsz = x_ref.shape[0]
    three_t = x_ref.shape[1]
    t_len = three_t // 3
    g4 = lstm_ref.shape[1]      # 4H
    h = g4 // 4

    # --- conv stack + LSTM-1 input projection + biases: ONE matmul (host-folded weights) ---
    # x_ref is the flat (B, 3T) view of stroke.reshape(B, 3, T).
    gwide = (jnp.dot(x_ref[...], wpre_ref[0:three_t, :], preferred_element_type=f32)
             + wpre_ref[three_t:three_t + 1, :])                     # (B, T*4H)

    # Packed LSTM weights (static sublane slices, loaded once).
    whh1 = lstm_ref[0:h, :]
    wih2 = lstm_ref[h:2 * h, :]
    whh2 = lstm_ref[2 * h:3 * h, :]
    b2 = lstm_ref[3 * h:3 * h + 1, :]

    rowid = jax.lax.broadcasted_iota(jnp.int32, (bsz, g4), 0)        # hoisted once

    h1 = jnp.zeros((bsz, h), f32)
    c1 = jnp.zeros((bsz, h), f32)
    h2 = jnp.zeros((bsz, h), f32)
    c2 = jnp.zeros((bsz, h), f32)
    acc = jnp.zeros((bsz, h), f32)

    # --- 2-layer LSTM, fully unrolled over time (T=8) ---
    for u in range(t_len):
        # Gather this step's precomputed gate input.  The PyTorch code's flat
        # (B,3,T)->(T,B,3) reshape mixes batch and time, so row (u, bb) comes from
        # gwide[(u*B+bb)//T, ((u*B+bb)%T)*4H : ...] -- 128-lane aligned static slices.
        parts = []
        for bb in range(bsz):
            r = u * bsz + bb
            rb, tin = r // t_len, r % t_len
            parts.append(gwide[rb:rb + 1, tin * g4:(tin + 1) * g4])  # (1, 4H)
        g_in = parts[0]
        for bb in range(1, bsz):
            g_in = jnp.where(rowid == bb, parts[bb], g_in)           # (B, 4H)

        # Layer 1 (b_ih1 + b_hh1 already folded into the wpre bias row).
        gates1 = g_in + jnp.dot(h1, whh1, preferred_element_type=f32)
        s1 = jax.nn.sigmoid(gates1)                                  # one full-row EUP pass
        g1 = jnp.tanh(gates1[:, 2 * h:3 * h])
        c1 = s1[:, h:2 * h] * c1 + s1[:, 0:h] * g1
        h1 = s1[:, 3 * h:4 * h] * jnp.tanh(c1)

        # Layer 2.
        gates2 = (jnp.dot(h1, wih2, preferred_element_type=f32)
                  + jnp.dot(h2, whh2, preferred_element_type=f32) + b2)
        s2 = jax.nn.sigmoid(gates2)
        g2 = jnp.tanh(gates2[:, 2 * h:3 * h])
        c2 = s2[:, h:2 * h] * c2 + s2[:, 0:h] * g2
        h2 = s2[:, 3 * h:4 * h] * jnp.tanh(c2)

        # pack/pad_packed_sequence + mean(dim=0): mask already contains 1/max(len).
        acc = acc + mask_ref[u * bsz:(u + 1) * bsz, :] * h2

    # --- RNN head: Dropout(id) + Linear(H,H) + ReLU + Dropout(id) ---
    wl = ha_ref[0:h, :]
    bl = ha_ref[h:h + 1, :]
    r = jnp.maximum(jnp.dot(acc, wl, preferred_element_type=f32) + bl, 0.0)

    # --- classifier over concat([cnn_feat, rnn_out]) + Sigmoid ---
    # CNN linear head folded into wcc3 / bias on the host; weights lane-padded to 128.
    wcr = hb_ref[0:h, :]
    wcc3 = hb_ref[h:h + 3, :]
    bcl = hb_ref[h + 3:h + 4, :]
    logits = (jnp.dot(r, wcr, preferred_element_type=f32)
              + jnp.dot(pooled_ref[...], wcc3, preferred_element_type=f32) + bcl)
    out_ref[...] = jax.nn.sigmoid(logits)                            # (B, 128) lane-dense


def _vspec(shape):
    n = len(shape)
    return pl.BlockSpec(shape, lambda i, _n=n: (0,) * _n)


def model_forward(image, stroke, stroke_lens, kp):
    b = image.shape[0]
    t = stroke.shape[0]

    # PyTorch: x.reshape((B, 3, T)) is a flat row-major reshape of the (T, B, 3) buffer;
    # keep the identical flat buffer as (B, 3T).
    x_flat = stroke.reshape(b, 3 * t)

    # CNN stand-in: global average pool done in the wrapper (image never enters VMEM).
    pooled = jnp.mean(image.reshape(b, 3, -1), axis=-1)              # (B, 3)

    # Temporal mask with the 1/max(len) normalizer folded in (guard against all-zero lens).
    lens = stroke_lens.astype(jnp.int32)
    max_len = jnp.maximum(jnp.max(lens), 1).astype(jnp.float32)
    steps = jnp.arange(t, dtype=jnp.int32)
    m = (steps[:, None] < lens[None, :]).astype(jnp.float32) / max_len        # (T, B)
    maskdiv = jnp.broadcast_to(m[:, :, None], (t, b, H)).reshape(t * b, H)    # (T*B, H)

    out_pad = pl.pallas_call(
        _fused_kernel,
        out_shape=jax.ShapeDtypeStruct((b, OUT_PAD), jnp.float32),
        grid=(1,),
        in_specs=[
            _vspec((b, 3 * t)),                 # x_flat
            _vspec((b, 3)),                     # pooled
            _vspec((t * b, H)),                 # maskdiv
            _vspec(kp["wpre"].shape),           # [Wconv@wih_sel ; bias]    (3T+1, T*4H)
            _vspec(kp["lstm"].shape),           # [whh1; wih2; whh2; b2]    (3H+1, 4H)
            _vspec(kp["head_a"].shape),         # [wl; bl]                  (H+1, H)
            _vspec(kp["head_b"].shape),         # [wcr; wcnn@wcc; bc]       (H+4, 128)
        ],
        out_specs=_vspec((b, OUT_PAD)),
        compiler_params=pltpu.CompilerParams(dimension_semantics=("arbitrary",)),
    )(x_flat, pooled, maskdiv, kp["wpre"], kp["lstm"], kp["head_a"], kp["head_b"])

    return out_pad[:, :NCLS]


# ----------------------------- host-side weight preprocessing -----------------------------
def prepare_params(p):
    """Fold conv stack / LSTM input projection / CNN head into packed kernel weights.

    All folds are done once, outside jit, in float64 (cast to f32 at the end).
    """
    g4 = 4 * H

    # Conv1d ("same" padding) as (3T, 3T) Toeplitz matrices on the flat (B, 3T) layout,
    # chained into one affine map (valid: no nonlinearity between the three convs).
    Wc = np.eye(3 * T, dtype=np.float64)
    bc = np.zeros((1, 3 * T), np.float64)
    for l in range(3):
        w = np.asarray(p[f"conv{l}_w"], np.float64)      # (3, 3, K)
        bias = np.asarray(p[f"conv{l}_b"], np.float64)   # (3,)
        wt = np.zeros((3 * T, 3 * T), np.float64)
        for co in range(3):
            for ci in range(3):
                for kk in range(K):
                    for tt in range(T):
                        s = tt + kk - PAD
                        if 0 <= s < T:
                            wt[ci * T + s, co * T + tt] = w[co, ci, kk]
        bt = np.repeat(bias, T)[None, :]
        Wc = Wc @ wt
        bc = bc @ wt + bt

    # wih1 expanded per timestep: sel[tin*3 + c, tin*4H + k] = wih1[c, k]; then fold with conv.
    wih1 = np.asarray(p["wih1"], np.float64)             # (3, 4H)
    sel = np.zeros((3 * T, T * g4), np.float64)
    for u in range(T):
        sel[3 * u:3 * u + 3, u * g4:(u + 1) * g4] = wih1
    wpre = Wc @ sel                                       # (3T, T*4H)
    bpre = bc @ sel + np.tile(np.asarray(p["b1"], np.float64), (1, T))   # fold LSTM-1 bias
    wpre_pack = np.concatenate([wpre, bpre], axis=0).astype(np.float32)  # (3T+1, T*4H)

    # LSTM recurrent weights packed.
    lstm_pack = np.concatenate(
        [np.asarray(p["whh1"], np.float32), np.asarray(p["wih2"], np.float32),
         np.asarray(p["whh2"], np.float32), np.asarray(p["b2"], np.float32)],
        axis=0)                                           # (3H+1, 4H)

    # RNN head (Linear + bias) packed.
    head_a = np.concatenate(
        [np.asarray(p["wl"], np.float32), np.asarray(p["bl"], np.float32)], axis=0)  # (H+1, H)

    # Classifier, with the CNN stand-in linear head folded in; lane-padded to 128.
    wcr = np.asarray(p["wcr"], np.float64)               # (H, NCLS)
    wcc = np.asarray(p["wcc"], np.float64)               # (CNN_H, NCLS)
    wcnn = np.asarray(p["wcnn"], np.float64)             # (3, CNN_H)
    bcnn = np.asarray(p["bcnn"], np.float64)             # (1, CNN_H)
    bcls = np.asarray(p["bc"], np.float64)               # (1, NCLS)
    wcc3 = wcnn @ wcc                                     # (3, NCLS)
    bfold = bcls + bcnn @ wcc                             # (1, NCLS)
    head_b = np.zeros((H + 4, OUT_PAD), np.float64)
    head_b[0:H, :NCLS] = wcr
    head_b[H:H + 3, :NCLS] = wcc3
    head_b[H + 3:H + 4, :NCLS] = bfold

    return {
        "wpre": jnp.asarray(wpre_pack),
        "lstm": jnp.asarray(lstm_pack),
        "head_a": jnp.asarray(head_a),
        "head_b": jnp.asarray(head_b.astype(np.float32)),
    }


# ----------------------------- pure-JAX reference (raw, unfolded params) -----------------------------
def ref_forward(image, stroke, stroke_lens, p):
    b = image.shape[0]
    t = stroke.shape[0]
    pooled = jnp.mean(image.reshape(b, 3, -1), axis=-1)
    cnn_feat = pooled @ p["wcnn"] + p["bcnn"]

    def conv(x, w, bias):
        xp = jnp.pad(x, ((0, 0), (0, 0), (PAD, PAD)))
        out = []
        for co in range(3):
            a = jnp.zeros((b, t)) + bias[co]
            for ci in range(3):
                for k in range(K):
                    a = a + w[co, ci, k] * xp[:, ci, k:k + t]
            out.append(a)
        return jnp.stack(out, axis=1)

    y = stroke.reshape(b, 3, t)
    for l in range(3):
        y = conv(y, p[f"conv{l}_w"], p[f"conv{l}_b"])
    x_tb3 = y.reshape(t, b, 3)

    h1 = c1 = h2 = c2 = jnp.zeros((b, H))
    acc = jnp.zeros((b, H))
    lens = stroke_lens.astype(jnp.int32)
    for step in range(t):
        xt = x_tb3[step]
        g1 = xt @ p["wih1"] + h1 @ p["whh1"] + p["b1"][0]
        i1, f1 = jax.nn.sigmoid(g1[:, :H]), jax.nn.sigmoid(g1[:, H:2 * H])
        gg1, o1 = jnp.tanh(g1[:, 2 * H:3 * H]), jax.nn.sigmoid(g1[:, 3 * H:])
        c1 = f1 * c1 + i1 * gg1
        h1 = o1 * jnp.tanh(c1)
        g2 = h1 @ p["wih2"] + h2 @ p["whh2"] + p["b2"][0]
        i2, f2 = jax.nn.sigmoid(g2[:, :H]), jax.nn.sigmoid(g2[:, H:2 * H])
        gg2, o2 = jnp.tanh(g2[:, 2 * H:3 * H]), jax.nn.sigmoid(g2[:, 3 * H:])
        c2 = f2 * c2 + i2 * gg2
        h2 = o2 * jnp.tanh(c2)
        acc = acc + jnp.where((step < lens)[:, None], h2, 0.0)
    rnn_mean = acc / jnp.maximum(jnp.max(lens), 1).astype(jnp.float32)

    r = jnp.maximum(rnn_mean @ p["wl"] + p["bl"], 0.0)
    return jax.nn.sigmoid(cnn_feat @ p["wcc"] + r @ p["wcr"] + p["bc"])


# ----------------------------- deterministic parameter init -----------------------------
def init_params(key):
    ks = jax.random.split(key, 16)
    u = lambda k, shape, fan_in: jax.random.uniform(
        k, shape, jnp.float32, -1.0 / jnp.sqrt(fan_in), 1.0 / jnp.sqrt(fan_in))
    p = {}
    for l in range(3):
        p[f"conv{l}_w"] = u(ks[l], (3, 3, K), 3 * K)
        p[f"conv{l}_b"] = u(ks[l + 3], (3,), 3 * K)
    p["wih1"] = u(ks[6], (3, 4 * H), H)
    p["whh1"] = u(ks[7], (H, 4 * H), H)
    p["b1"] = u(ks[8], (1, 4 * H), H)          # b_ih1 + b_hh1 combined
    p["wih2"] = u(ks[9], (H, 4 * H), H)
    p["whh2"] = u(ks[10], (H, 4 * H), H)
    p["b2"] = u(ks[11], (1, 4 * H), H)
    p["wl"] = u(ks[12], (H, H), H)
    p["bl"] = u(ks[12], (1, H), H)
    p["wcnn"] = u(ks[13], (3, CNN_H), 3)
    p["bcnn"] = u(ks[13], (1, CNN_H), 3)
    p["wcr"] = u(ks[14], (H, NCLS), H + CNN_H)
    p["wcc"] = u(ks[15], (CNN_H, NCLS), H + CNN_H)
    p["bc"] = u(ks[15], (1, NCLS), H + CNN_H)
    return p


if __name__ == "__main__":
    key = jax.random.PRNGKey(0)
    k_img, k_str, k_par = jax.random.split(key, 3)

    image = jax.random.normal(k_img, (B, 3, IMG, IMG), jnp.float32)   # NCHW
    stroke = jax.random.normal(k_str, (T, B, 3), jnp.float32)         # (T, B, 3)
    stroke_lens = jnp.array([T, 5], dtype=jnp.int32)                  # (B,)

    params = init_params(k_par)          # raw weights (used by the reference)
    kparams = prepare_params(params)     # host-folded, packed kernel weights

    fwd = jax.jit(model_forward)
    out = jax.block_until_ready(fwd(image, stroke, stroke_lens, kparams))

    with jax.default_matmul_precision("float32"):
        ref = ref_forward(image, stroke, stroke_lens, params)

    assert out.shape == (B, NCLS), out.shape
    err = float(jnp.max(jnp.abs(out - ref)))
    # 1e-3: tight enough to catch any layout / permutation / folding mistake (those produce
    # O(1e-1) errors) while tolerating MXU f32 multi-pass vs XLA precision-path differences.
    assert err < 1e-3, err

    print("KERNEL_OK")
</pallas_src>

<mosaic_0001>
module attributes {stable_mosaic.version = 11 : i64} {
  func.func @_fused_kernel(%arg0: i32, %arg1: memref<2x24xf32, #tpu.memory_space<vmem>>, %arg2: memref<2x3xf32, #tpu.memory_space<vmem>>, %arg3: memref<16x32xf32, #tpu.memory_space<vmem>>, %arg4: memref<25x1024xf32, #tpu.memory_space<vmem>>, %arg5: memref<97x128xf32, #tpu.memory_space<vmem>>, %arg6: memref<33x32xf32, #tpu.memory_space<vmem>>, %arg7: memref<36x128xf32, #tpu.memory_space<vmem>>, %arg8: memref<2x128xf32, #tpu.memory_space<vmem>>) attributes {dimension_semantics = [#tpu.dimension_semantics<arbitrary>], iteration_bounds = array<i64: 1>, scalar_prefetch = 0 : i64, scratch_operands = 0 : i64, tpu.core_type = #tpu.core_type<tc>, window_params = [{pipeline_mode = #tpu.pipeline_mode<synchronous>, transform_indices = @transform_0, window_bounds = array<i64: 2, 24>}, {pipeline_mode = #tpu.pipeline_mode<synchronous>, transform_indices = @transform_1, window_bounds = array<i64: 2, 3>}, {pipeline_mode = #tpu.pipeline_mode<synchronous>, transform_indices = @transform_2, window_bounds = array<i64: 16, 32>}, {pipeline_mode = #tpu.pipeline_mode<synchronous>, transform_indices = @transform_3, window_bounds = array<i64: 25, 1024>}, {pipeline_mode = #tpu.pipeline_mode<synchronous>, transform_indices = @transform_4, window_bounds = array<i64: 97, 128>}, {pipeline_mode = #tpu.pipeline_mode<synchronous>, transform_indices = @transform_5, window_bounds = array<i64: 33, 32>}, {pipeline_mode = #tpu.pipeline_mode<synchronous>, transform_indices = @transform_6, window_bounds = array<i64: 36, 128>}, {pipeline_mode = #tpu.pipeline_mode<synchronous>, transform_indices = @transform_7, window_bounds = array<i64: 2, 128>}]} {
    %c0 = arith.constant 0 : index
    %c0_0 = arith.constant 0 : index
    %0 = vector.load %arg1[%c0, %c0_0] : memref<2x24xf32, #tpu.memory_space<vmem>>, vector<2x24xf32>
    %c0_1 = arith.constant 0 : index
    %c0_2 = arith.constant 0 : index
    %1 = vector.load %arg4[%c0_1, %c0_2] : memref<25x1024xf32, #tpu.memory_space<vmem>>, vector<24x1024xf32>
    %cst = arith.constant dense<0.000000e+00> : vector<2x1024xf32>
    %2 = tpu.matmul %0, %1, %cst {dimension_numbers = #tpu.dot_dimension_numbers<[1], [0], [0], [1], [0, 0, 1, 1], [], []>} : vector<2x24xf32>, vector<24x1024xf32>, vector<2x1024xf32> -> vector<2x1024xf32>
    %c24 = arith.constant 24 : index
    %c0_3 = arith.constant 0 : index
    %3 = vector.load %arg4[%c24, %c0_3] : memref<25x1024xf32, #tpu.memory_space<vmem>>, vector<1x1024xf32>
    %4 = vector.broadcast %3 : vector<1x1024xf32> to vector<2x1024xf32>
    %5 = arith.addf %2, %4 : vector<2x1024xf32>
    %c0_4 = arith.constant 0 : index
    %c0_5 = arith.constant 0 : index
    %6 = vector.load %arg5[%c0_4, %c0_5] : memref<97x128xf32, #tpu.memory_space<vmem>>, vector<32x128xf32>
    %c32 = arith.constant 32 : index
    %c0_6 = arith.constant 0 : index
    %7 = vector.load %arg5[%c32, %c0_6] : memref<97x128xf32, #tpu.memory_space<vmem>>, vector<32x128xf32>
    %c64 = arith.constant 64 : index
    %c0_7 = arith.constant 0 : index
    %8 = vector.load %arg5[%c64, %c0_7] : memref<97x128xf32, #tpu.memory_space<vmem>>, vector<32x128xf32>
    %c96 = arith.constant 96 : index
    %c0_8 = arith.constant 0 : index
    %9 = vector.load %arg5[%c96, %c0_8] : memref<97x128xf32, #tpu.memory_space<vmem>>, vector<1x128xf32>
    %10 = tpu.iota {dimensions = array<i32: 0>} : vector<2x128xi32>
    %cst_9 = arith.constant 0.000000e+00 : f32
    %11 = vector.broadcast %cst_9 : f32 to vector<2x32xf32>
    %cst_10 = arith.constant 0.000000e+00 : f32
    %12 = vector.broadcast %cst_10 : f32 to vector<2x32xf32>
    %cst_11 = arith.constant 0.000000e+00 : f32
    %13 = vector.broadcast %cst_11 : f32 to vector<2x32xf32>
    %cst_12 = arith.constant 0.000000e+00 : f32
    %14 = vector.broadcast %cst_12 : f32 to vector<2x32xf32>
    %cst_13 = arith.constant 0.000000e+00 : f32
    %15 = vector.broadcast %cst_13 : f32 to vector<2x32xf32>
    %16 = vector.extract_strided_slice %5 {offsets = [0, 0], sizes = [1, 128], strides = [1, 1]} : vector<2x1024xf32> to vector<1x128xf32>
    %17 = vector.extract_strided_slice %5 {offsets = [0, 128], sizes = [1, 128], strides = [1, 1]} : vector<2x1024xf32> to vector<1x128xf32>
    %c1_i32 = arith.constant 1 : i32
    %18 = vector.broadcast %c1_i32 : i32 to vector<2x128xi32>
    %19 = arith.cmpi eq, %10, %18 : vector<2x128xi32>
    %20 = vector.shape_cast %17 : vector<1x128xf32> to vector<1x128xf32>
    %21 = vector.broadcast %20 : vector<1x128xf32> to vector<2x128xf32>
    %22 = vector.shape_cast %16 : vector<1x128xf32> to vector<1x128xf32>
    %23 = vector.broadcast %22 : vector<1x128xf32> to vector<2x128xf32>
    %24 = arith.select %19, %21, %23 : vector<2x128xi1>, vector<2x128xf32>
    %cst_14 = arith.constant dense<0.000000e+00> : vector<2x128xf32>
    %25 = tpu.matmul %11, %6, %cst_14 {dimension_numbers = #tpu.dot_dimension_numbers<[1], [0], [0], [1], [0, 0, 1, 1], [], []>} : vector<2x32xf32>, vector<32x128xf32>, vector<2x128xf32> -> vector<2x128xf32>
    %26 = arith.addf %24, %25 : vector<2x128xf32>
    %27 = arith.negf %26 : vector<2x128xf32>
    %28 = math.exp %27 : vector<2x128xf32>
    %cst_15 = arith.constant 1.000000e+00 : f32
    %29 = vector.broadcast %cst_15 : f32 to vector<2x128xf32>
    %30 = arith.addf %29, %28 : vector<2x128xf32>
    %31 = arith.divf %29, %30 : vector<2x128xf32>
    %32 = vector.extract_strided_slice %26 {offsets = [0, 64], sizes = [2, 32], strides = [1, 1]} : vector<2x128xf32> to vector<2x32xf32>
    %33 = math.tanh %32 : vector<2x32xf32>
    %34 = vector.extract_strided_slice %31 {offsets = [0, 32], sizes = [2, 32], strides = [1, 1]} : vector<2x128xf32> to vector<2x32xf32>
    %35 = arith.mulf %34, %12 : vector<2x32xf32>
    %36 = vector.extract_strided_slice %31 {offsets = [0, 0], sizes = [2, 32], strides = [1, 1]} : vector<2x128xf32> to vector<2x32xf32>
    %37 = arith.mulf %36, %33 : vector<2x32xf32>
    %38 = arith.addf %35, %37 : vector<2x32xf32>
    %39 = vector.extract_strided_slice %31 {offsets = [0, 96], sizes = [2, 32], strides = [1, 1]} : vector<2x128xf32> to vector<2x32xf32>
    %40 = math.tanh %38 : vector<2x32xf32>
    %41 = arith.mulf %39, %40 : vector<2x32xf32>
    %cst_16 = arith.constant dense<0.000000e+00> : vector<2x128xf32>
    %42 = tpu.matmul %41, %7, %cst_16 {dimension_numbers = #tpu.dot_dimension_numbers<[1], [0], [0], [1], [0, 0, 1, 1], [], []>} : vector<2x32xf32>, vector<32x128xf32>, vector<2x128xf32> -> vector<2x128xf32>
    %cst_17 = arith.constant dense<0.000000e+00> : vector<2x128xf32>
    %43 = tpu.matmul %13, %8, %cst_17 {dimension_numbers = #tpu.dot_dimension_numbers<[1], [0], [0], [1], [0, 0, 1, 1], [], []>} : vector<2x32xf32>, vector<32x128xf32>, vector<2x128xf32> -> vector<2x128xf32>
    %44 = arith.addf %42, %43 : vector<2x128xf32>
    %45 = vector.broadcast %9 : vector<1x128xf32> to vector<2x128xf32>
    %46 = arith.addf %44, %45 : vector<2x128xf32>
    %47 = arith.negf %46 : vector<2x128xf32>
    %48 = math.exp %47 : vector<2x128xf32>
    %cst_18 = arith.constant 1.000000e+00 : f32
    %49 = vector.broadcast %cst_18 : f32 to vector<2x128xf32>
    %50 = arith.addf %49, %48 : vector<2x128xf32>
    %51 = arith.divf %49, %50 : vector<2x128xf32>
    %52 = vector.extract_strided_slice %46 {offsets = [0, 64], sizes = [2, 32], strides = [1, 1]} : vector<2x128xf32> to vector<2x32xf32>
    %53 = math.tanh %52 : vector<2x32xf32>
    %54 = vector.extract_strided_slice %51 {offsets = [0, 32], sizes = [2, 32], strides = [1, 1]} : vector<2x128xf32> to vector<2x32xf32>
    %55 = arith.mulf %54, %14 : vector<2x32xf32>
    %56 = vector.extract_strided_slice %51 {offsets = [0, 0], sizes = [2, 32], strides = [1, 1]} : vector<2x128xf32> to vector<2x32xf32>
    %57 = arith.mulf %56, %53 : vector<2x32xf32>
    %58 = arith.addf %55, %57 : vector<2x32xf32>
    %59 = vector.extract_strided_slice %51 {offsets = [0, 96], sizes = [2, 32], strides = [1, 1]} : vector<2x128xf32> to vector<2x32xf32>
    %60 = math.tanh %58 : vector<2x32xf32>
    %61 = arith.mulf %59, %60 : vector<2x32xf32>
    %c0_19 = arith.constant 0 : index
    %c0_20 = arith.constant 0 : index
    %62 = vector.load %arg3[%c0_19, %c0_20] : memref<16x32xf32, #tpu.memory_space<vmem>>, vector<2x32xf32>
    %63 = arith.mulf %62, %61 : vector<2x32xf32>
    %64 = arith.addf %15, %63 : vector<2x32xf32>
    %65 = vector.extract_strided_slice %5 {offsets = [0, 256], sizes = [1, 128], strides = [1, 1]} : vector<2x1024xf32> to vector<1x128xf32>
    %66 = vector.extract_strided_slice %5 {offsets = [0, 384], sizes = [1, 128], strides = [1, 1]} : vector<2x1024xf32> to vector<1x128xf32>
    %c1_i32_21 = arith.constant 1 : i32
    %67 = vector.broadcast %c1_i32_21 : i32 to vector<2x128xi32>
    %68 = arith.cmpi eq, %10, %67 : vector<2x128xi32>
    %69 = vector.shape_cast %66 : vector<1x128xf32> to vector<1x128xf32>
    %70 = vector.broadcast %69 : vector<1x128xf32> to vector<2x128xf32>
    %71 = vector.shape_cast %65 : vector<1x128xf32> to vector<1x128xf32>
    %72 = vector.broadcast %71 : vector<1x128xf32> to vector<2x128xf32>
    %73 = arith.select %68, %70, %72 : vector<2x128xi1>, vector<2x128xf32>
    %cst_22 = arith.constant dense<0.000000e+00> : vector<2x128xf32>
    %74 = tpu.matmul %41, %6, %cst_22 {dimension_numbers = #tpu.dot_dimension_numbers<[1], [0], [0], [1], [0, 0, 1, 1], [], []>} : vector<2x32xf32>, vector<32x128xf32>, vector<2x128xf32> -> vector<2x128xf32>
    %75 = arith.addf %73, %74 : vector<2x128xf32>
    %76 = arith.negf %75 : vector<2x128xf32>
    %77 = math.exp %76 : vector<2x128xf32>
    %cst_23 = arith.constant 1.000000e+00 : f32
    %78 = vector.broadcast %cst_23 : f32 to vector<2x128xf32>
    %79 = arith.addf %78, %77 : vector<2x128xf32>
    %80 = arith.divf %78, %79 : vector<2x128xf32>
    %81 = vector.extract_strided_slice %75 {offsets = [0, 64], sizes = [2, 32], strides = [1, 1]} : vector<2x128xf32> to vector<2x32xf32>
    %82 = math.tanh %81 : vector<2x32xf32>
    %83 = vector.extract_strided_slice %80 {offsets = [0, 32], sizes = [2, 32], strides = [1, 1]} : vector<2x128xf32> to vector<2x32xf32>
    %84 = arith.mulf %83, %38 : vector<2x32xf32>
    %85 = vector.extract_strided_slice %80 {offsets = [0, 0], sizes = [2, 32], strides = [1, 1]} : vector<2x128xf32> to vector<2x32xf32>
    %86 = arith.mulf %85, %82 : vector<2x32xf32>
    %87 = arith.addf %84, %86 : vector<2x32xf32>
    %88 = vector.extract_strided_slice %80 {offsets = [0, 96], sizes = [2, 32], strides = [1, 1]} : vector<2x128xf32> to vector<2x32xf32>
    %89 = math.tanh %87 : vector<2x32xf32>
    %90 = arith.mulf %88, %89 : vector<2x32xf32>
    %cst_24 = arith.constant dense<0.000000e+00> : vector<2x128xf32>
    %91 = tpu.matmul %90, %7, %cst_24 {dimension_numbers = #tpu.dot_dimension_numbers<[1], [0], [0], [1], [0, 0, 1, 1], [], []>} : vector<2x32xf32>, vector<32x128xf32>, vector<2x128xf32> -> vector<2x128xf32>
    %cst_25 = arith.constant dense<0.000000e+00> : vector<2x128xf32>
    %92 = tpu.matmul %61, %8, %cst_25 {dimension_numbers = #tpu.dot_dimension_numbers<[1], [0], [0], [1], [0, 0, 1, 1], [], []>} : vector<2x32xf32>, vector<32x128xf32>, vector<2x128xf32> -> vector<2x128xf32>
    %93 = arith.addf %91, %92 : vector<2x128xf32>
    %94 = vector.broadcast %9 : vector<1x128xf32> to vector<2x128xf32>
    %95 = arith.addf %93, %94 : vector<2x128xf32>
    %96 = arith.negf %95 : vector<2x128xf32>
    %97 = math.exp %96 : vector<2x128xf32>
    %cst_26 = arith.constant 1.000000e+00 : f32
    %98 = vector.broadcast %cst_26 : f32 to vector<2x128xf32>
    %99 = arith.addf %98, %97 : vector<2x128xf32>
    %100 = arith.divf %98, %99 : vector<2x128xf32>
    %101 = vector.extract_strided_slice %95 {offsets = [0, 64], sizes = [2, 32], strides = [1, 1]} : vector<2x128xf32> to vector<2x32xf32>
    %102 = math.tanh %101 : vector<2x32xf32>
    %103 = vector.extract_strided_slice %100 {offsets = [0, 32], sizes = [2, 32], strides = [1, 1]} : vector<2x128xf32> to vector<2x32xf32>
    %104 = arith.mulf %103, %58 : vector<2x32xf32>
    %105 = vector.extract_strided_slice %100 {offsets = [0, 0], sizes = [2, 32], strides = [1, 1]} : vector<2x128xf32> to vector<2x32xf32>
    %106 = arith.mulf %105, %102 : vector<2x32xf32>
    %107 = arith.addf %104, %106 : vector<2x32xf32>
    %108 = vector.extract_strided_slice %100 {offsets = [0, 96], sizes = [2, 32], strides = [1, 1]} : vector<2x128xf32> to vector<2x32xf32>
    %109 = math.tanh %107 : vector<2x32xf32>
    %110 = arith.mulf %108, %109 : vector<2x32xf32>
    %c2 = arith.constant 2 : index
    %c0_27 = arith.constant 0 : index
    %111 = vector.load %arg3[%c2, %c0_27] : memref<16x32xf32, #tpu.memory_space<vmem>>, vector<2x32xf32>
    %112 = arith.mulf %111, %110 : vector<2x32xf32>
    %113 = arith.addf %64, %112 : vector<2x32xf32>
    %114 = vector.extract_strided_slice %5 {offsets = [0, 512], sizes = [1, 128], strides = [1, 1]} : vector<2x1024xf32> to vector<1x128xf32>
    %115 = vector.extract_strided_slice %5 {offsets = [0, 640], sizes = [1, 128], strides = [1, 1]} : vector<2x1024xf32> to vector<1x128xf32>
    %c1_i32_28 = arith.constant 1 : i32
    %116 = vector.broadcast %c1_i32_28 : i32 to vector<2x128xi32>
    %117 = arith.cmpi eq, %10, %116 : vector<2x128xi32>
    %118 = vector.shape_cast %115 : vector<1x128xf32> to vector<1x128xf32>
    %119 = vector.broadcast %118 : vector<1x128xf32> to vector<2x128xf32>
    %120 = vector.shape_cast %114 : vector<1x128xf32> to vector<1x128xf32>
    %121 = vector.broadcast %120 : vector<1x128xf32> to vector<2x128xf32>
    %122 = arith.select %117, %119, %121 : vector<2x128xi1>, vector<2x128xf32>
    %cst_29 = arith.constant dense<0.000000e+00> : vector<2x128xf32>
    %123 = tpu.matmul %90, %6, %cst_29 {dimension_numbers = #tpu.dot_dimension_numbers<[1], [0], [0], [1], [0, 0, 1, 1], [], []>} : vector<2x32xf32>, vector<32x128xf32>, vector<2x128xf32> -> vector<2x128xf32>
    %124 = arith.addf %122, %123 : vector<2x128xf32>
    %125 = arith.negf %124 : vector<2x128xf32>
    %126 = math.exp %125 : vector<2x128xf32>
    %cst_30 = arith.constant 1.000000e+00 : f32
    %127 = vector.broadcast %cst_30 : f32 to vector<2x128xf32>
    %128 = arith.addf %127, %126 : vector<2x128xf32>
    %129 = arith.divf %127, %128 : vector<2x128xf32>
    %130 = vector.extract_strided_slice %124 {offsets = [0, 64], sizes = [2, 32], strides = [1, 1]} : vector<2x128xf32> to vector<2x32xf32>
    %131 = math.tanh %130 : vector<2x32xf32>
    %132 = vector.extract_strided_slice %129 {offsets = [0, 32], sizes = [2, 32], strides = [1, 1]} : vector<2x128xf32> to vector<2x32xf32>
    %133 = arith.mulf %132, %87 : vector<2x32xf32>
    %134 = vector.extract_strided_slice %129 {offsets = [0, 0], sizes = [2, 32], strides = [1, 1]} : vector<2x128xf32> to vector<2x32xf32>
    %135 = arith.mulf %134, %131 : vector<2x32xf32>
    %136 = arith.addf %133, %135 : vector<2x32xf32>
    %137 = vector.extract_strided_slice %129 {offsets = [0, 96], sizes = [2, 32], strides = [1, 1]} : vector<2x128xf32> to vector<2x32xf32>
    %138 = math.tanh %136 : vector<2x32xf32>
    %139 = arith.mulf %137, %138 : vector<2x32xf32>
    %cst_31 = arith.constant dense<0.000000e+00> : vector<2x128xf32>
    %140 = tpu.matmul %139, %7, %cst_31 {dimension_numbers = #tpu.dot_dimension_numbers<[1], [0], [0], [1], [0, 0, 1, 1], [], []>} : vector<2x32xf32>, vector<32x128xf32>, vector<2x128xf32> -> vector<2x128xf32>
    %cst_32 = arith.constant dense<0.000000e+00> : vector<2x128xf32>
    %141 = tpu.matmul %110, %8, %cst_32 {dimension_numbers = #tpu.dot_dimension_numbers<[1], [0], [0], [1], [0, 0, 1, 1], [], []>} : vector<2x32xf32>, vector<32x128xf32>, vector<2x128xf32> -> vector<2x128xf32>
    %142 = arith.addf %140, %141 : vector<2x128xf32>
    %143 = vector.broadcast %9 : vector<1x128xf32> to vector<2x128xf32>
    %144 = arith.addf %142, %143 : vector<2x128xf32>
    %145 = arith.negf %144 : vector<2x128xf32>
    %146 = math.exp %145 : vector<2x128xf32>
    %cst_33 = arith.constant 1.000000e+00 : f32
    %147 = vector.broadcast %cst_33 : f32 to vector<2x128xf32>
    %148 = arith.addf %147, %146 : vector<2x128xf32>
    %149 = arith.divf %147, %148 : vector<2x128xf32>
    %150 = vector.extract_strided_slice %144 {offsets = [0, 64], sizes = [2, 32], strides = [1, 1]} : vector<2x128xf32> to vector<2x32xf32>
    %151 = math.tanh %150 : vector<2x32xf32>
    %152 = vector.extract_strided_slice %149 {offsets = [0, 32], sizes = [2, 32], strides = [1, 1]} : vector<2x128xf32> to vector<2x32xf32>
    %153 = arith.mulf %152, %107 : vector<2x32xf32>
    %154 = vector.extract_strided_slice %149 {offsets = [0, 0], sizes = [2, 32], strides = [1, 1]} : vector<2x128xf32> to vector<2x32xf32>
    %155 = arith.mulf %154, %151 : vector<2x32xf32>
    %156 = arith.addf %153, %155 : vector<2x32xf32>
    %157 = vector.extract_strided_slice %149 {offsets = [0, 96], sizes = [2, 32], strides = [1, 1]} : vector<2x128xf32> to vector<2x32xf32>
    %158 = math.tanh %156 : vector<2x32xf32>
    %159 = arith.mulf %157, %158 : vector<2x32xf32>
    %c4 = arith.constant 4 : index
    %c0_34 = arith.constant 0 : index
    %160 = vector.load %arg3[%c4, %c0_34] : memref<16x32xf32, #tpu.memory_space<vmem>>, vector<2x32xf32>
    %161 = arith.mulf %160, %159 : vector<2x32xf32>
    %162 = arith.addf %113, %161 : vector<2x32xf32>
    %163 = vector.extract_strided_slice %5 {offsets = [0, 768], sizes = [1, 128], strides = [1, 1]} : vector<2x1024xf32> to vector<1x128xf32>
    %164 = vector.extract_strided_slice %5 {offsets = [0, 896], sizes = [1, 128], strides = [1, 1]} : vector<2x1024xf32> to vector<1x128xf32>
    %c1_i32_35 = arith.constant 1 : i32
    %165 = vector.broadcast %c1_i32_35 : i32 to vector<2x128xi32>
    %166 = arith.cmpi eq, %10, %165 : vector<2x128xi32>
    %167 = vector.shape_cast %164 : vector<1x128xf32> to vector<1x128xf32>
    %168 = vector.broadcast %167 : vector<1x128xf32> to vector<2x128xf32>
    %169 = vector.shape_cast %163 : vector<1x128xf32> to vector<1x128xf32>
    %170 = vector.broadcast %169 : vector<1x128xf32> to vector<2x128xf32>
    %171 = arith.select %166, %168, %170 : vector<2x128xi1>, vector<2x128xf32>
    %cst_36 = arith.constant dense<0.000000e+00> : vector<2x128xf32>
    %172 = tpu.matmul %139, %6, %cst_36 {dimension_numbers = #tpu.dot_dimension_numbers<[1], [0], [0], [1], [0, 0, 1, 1], [], []>} : vector<2x32xf32>, vector<32x128xf32>, vector<2x128xf32> -> vector<2x128xf32>
    %173 = arith.addf %171, %172 : vector<2x128xf32>
    %174 = arith.negf %173 : vector<2x128xf32>
    %175 = math.exp %174 : vector<2x128xf32>
    %cst_37 = arith.constant 1.000000e+00 : f32
    %176 = vector.broadcast %cst_37 : f32 to vector<2x128xf32>
    %177 = arith.addf %176, %175 : vector<2x128xf32>
    %178 = arith.divf %176, %177 : vector<2x128xf32>
    %179 = vector.extract_strided_slice %173 {offsets = [0, 64], sizes = [2, 32], strides = [1, 1]} : vector<2x128xf32> to vector<2x32xf32>
    %180 = math.tanh %179 : vector<2x32xf32>
    %181 = vector.extract_strided_slice %178 {offsets = [0, 32], sizes = [2, 32], strides = [1, 1]} : vector<2x128xf32> to vector<2x32xf32>
    %182 = arith.mulf %181, %136 : vector<2x32xf32>
    %183 = vector.extract_strided_slice %178 {offsets = [0, 0], sizes = [2, 32], strides = [1, 1]} : vector<2x128xf32> to vector<2x32xf32>
    %184 = arith.mulf %183, %180 : vector<2x32xf32>
    %185 = arith.addf %182, %184 : vector<2x32xf32>
    %186 = vector.extract_strided_slice %178 {offsets = [0, 96], sizes = [2, 32], strides = [1, 1]} : vector<2x128xf32> to vector<2x32xf32>
    %187 = math.tanh %185 : vector<2x32xf32>
    %188 = arith.mulf %186, %187 : vector<2x32xf32>
    %cst_38 = arith.constant dense<0.000000e+00> : vector<2x128xf32>
    %189 = tpu.matmul %188, %7, %cst_38 {dimension_numbers = #tpu.dot_dimension_numbers<[1], [0], [0], [1], [0, 0, 1, 1], [], []>} : vector<2x32xf32>, vector<32x128xf32>, vector<2x128xf32> -> vector<2x128xf32>
    %cst_39 = arith.constant dense<0.000000e+00> : vector<2x128xf32>
    %190 = tpu.matmul %159, %8, %cst_39 {dimension_numbers = #tpu.dot_dimension_numbers<[1], [0], [0], [1], [0, 0, 1, 1], [], []>} : vector<2x32xf32>, vector<32x128xf32>, vector<2x128xf32> -> vector<2x128xf32>
    %191 = arith.addf %189, %190 : vector<2x128xf32>
    %192 = vector.broadcast %9 : vector<1x128xf32> to vector<2x128xf32>
    %193 = arith.addf %191, %192 : vector<2x128xf32>
    %194 = arith.negf %193 : vector<2x128xf32>
    %195 = math.exp %194 : vector<2x128xf32>
    %cst_40 = arith.constant 1.000000e+00 : f32
    %196 = vector.broadcast %cst_40 : f32 to vector<2x128xf32>
    %197 = arith.addf %196, %195 : vector<2x128xf32>
    %198 = arith.divf %196, %197 : vector<2x128xf32>
    %199 = vector.extract_strided_slice %193 {offsets = [0, 64], sizes = [2, 32], strides = [1, 1]} : vector<2x128xf32> to vector<2x32xf32>
    %200 = math.tanh %199 : vector<2x32xf32>
    %201 = vector.extract_strided_slice %198 {offsets = [0, 32], sizes = [2, 32], strides = [1, 1]} : vector<2x128xf32> to vector<2x32xf32>
    %202 = arith.mulf %201, %156 : vector<2x32xf32>
    %203 = vector.extract_strided_slice %198 {offsets = [0, 0], sizes = [2, 32], strides = [1, 1]} : vector<2x128xf32> to vector<2x32xf32>
    %204 = arith.mulf %203, %200 : vector<2x32xf32>
    %205 = arith.addf %202, %204 : vector<2x32xf32>
    %206 = vector.extract_strided_slice %198 {offsets = [0, 96], sizes = [2, 32], strides = [1, 1]} : vector<2x128xf32> to vector<2x32xf32>
    %207 = math.tanh %205 : vector<2x32xf32>
    %208 = arith.mulf %206, %207 : vector<2x32xf32>
    %c6 = arith.constant 6 : index
    %c0_41 = arith.constant 0 : index
    %209 = vector.load %arg3[%c6, %c0_41] : memref<16x32xf32, #tpu.memory_space<vmem>>, vector<2x32xf32>
    %210 = arith.mulf %209, %208 : vector<2x32xf32>
    %211 = arith.addf %162, %210 : vector<2x32xf32>
    %212 = vector.extract_strided_slice %5 {offsets = [1, 0], sizes = [1, 128], strides = [1, 1]} : vector<2x1024xf32> to vector<1x128xf32>
    %213 = vector.extract_strided_slice %5 {offsets = [1, 128], sizes = [1, 128], strides = [1, 1]} : vector<2x1024xf32> to vector<1x128xf32>
    %c1_i32_42 = arith.constant 1 : i32
    %214 = vector.broadcast %c1_i32_42 : i32 to vector<2x128xi32>
    %215 = arith.cmpi eq, %10, %214 : vector<2x128xi32>
    %216 = vector.shape_cast %213 : vector<1x128xf32> to vector<1x128xf32>
    %217 = vector.broadcast %216 : vector<1x128xf32> to vector<2x128xf32>
    %218 = vector.shape_cast %212 : vector<1x128xf32> to vector<1x128xf32>
    %219 = vector.broadcast %218 : vector<1x128xf32> to vector<2x128xf32>
    %220 = arith.select %215, %217, %219 : vector<2x128xi1>, vector<2x128xf32>
    %cst_43 = arith.constant dense<0.000000e+00> : vector<2x128xf32>
    %221 = tpu.matmul %188, %6, %cst_43 {dimension_numbers = #tpu.dot_dimension_numbers<[1], [0], [0], [1], [0, 0, 1, 1], [], []>} : vector<2x32xf32>, vector<32x128xf32>, vector<2x128xf32> -> vector<2x128xf32>
    %222 = arith.addf %220, %221 : vector<2x128xf32>
    %223 = arith.negf %222 : vector<2x128xf32>
    %224 = math.exp %223 : vector<2x128xf32>
    %cst_44 = arith.constant 1.000000e+00 : f32
    %225 = vector.broadcast %cst_44 : f32 to vector<2x128xf32>
    %226 = arith.addf %225, %224 : vector<2x128xf32>
    %227 = arith.divf %225, %226 : vector<2x128xf32>
    %228 = vector.extract_strided_slice %222 {offsets = [0, 64], sizes = [2, 32], strides = [1, 1]} : vector<2x128xf32> to vector<2x32xf32>
    %229 = math.tanh %228 : vector<2x32xf32>
    %230 = vector.extract_strided_slice %227 {offsets = [0, 32], sizes = [2, 32], strides = [1, 1]} : vector<2x128xf32> to vector<2x32xf32>
    %231 = arith.mulf %230, %185 : vector<2x32xf32>
    %232 = vector.extract_strided_slice %227 {offsets = [0, 0], sizes = [2, 32], strides = [1, 1]} : vector<2x128xf32> to vector<2x32xf32>
    %233 = arith.mulf %232, %229 : vector<2x32xf32>
    %234 = arith.addf %231, %233 : vector<2x32xf32>
    %235 = vector.extract_strided_slice %227 {offsets = [0, 96], sizes = [2, 32], strides = [1, 1]} : vector<2x128xf32> to vector<2x32xf32>
    %236 = math.tanh %234 : vector<2x32xf32>
    %237 = arith.mulf %235, %236 : vector<2x32xf32>
    %cst_45 = arith.constant dense<0.000000e+00> : vector<2x128xf32>
    %238 = tpu.matmul %237, %7, %cst_45 {dimension_numbers = #tpu.dot_dimension_numbers<[1], [0], [0], [1], [0, 0, 1, 1], [], []>} : vector<2x32xf32>, vector<32x128xf32>, vector<2x128xf32> -> vector<2x128xf32>
    %cst_46 = arith.constant dense<0.000000e+00> : vector<2x128xf32>
    %239 = tpu.matmul %208, %8, %cst_46 {dimension_numbers = #tpu.dot_dimension_numbers<[1], [0], [0], [1], [0, 0, 1, 1], [], []>} : vector<2x32xf32>, vector<32x128xf32>, vector<2x128xf32> -> vector<2x128xf32>
    %240 = arith.addf %238, %239 : vector<2x128xf32>
    %241 = vector.broadcast %9 : vector<1x128xf32> to vector<2x128xf32>
    %242 = arith.addf %240, %241 : vector<2x128xf32>
    %243 = arith.negf %242 : vector<2x128xf32>
    %244 = math.exp %243 : vector<2x128xf32>
    %cst_47 = arith.constant 1.000000e+00 : f32
    %245 = vector.broadcast %cst_47 : f32 to vector<2x128xf32>
    %246 = arith.addf %245, %244 : vector<2x128xf32>
    %247 = arith.divf %245, %246 : vector<2x128xf32>
    %248 = vector.extract_strided_slice %242 {offsets = [0, 64], sizes = [2, 32], strides = [1, 1]} : vector<2x128xf32> to vector<2x32xf32>
    %249 = math.tanh %248 : vector<2x32xf32>
    %250 = vector.extract_strided_slice %247 {offsets = [0, 32], sizes = [2, 32], strides = [1, 1]} : vector<2x128xf32> to vector<2x32xf32>
    %251 = arith.mulf %250, %205 : vector<2x32xf32>
    %252 = vector.extract_strided_slice %247 {offsets = [0, 0], sizes = [2, 32], strides = [1, 1]} : vector<2x128xf32> to vector<2x32xf32>
    %253 = arith.mulf %252, %249 : vector<2x32xf32>
    %254 = arith.addf %251, %253 : vector<2x32xf32>
    %255 = vector.extract_strided_slice %247 {offsets = [0, 96], sizes = [2, 32], strides = [1, 1]} : vector<2x128xf32> to vector<2x32xf32>
    %256 = math.tanh %254 : vector<2x32xf32>
    %257 = arith.mulf %255, %256 : vector<2x32xf32>
    %c8 = arith.constant 8 : index
    %c0_48 = arith.constant 0 : index
    %258 = vector.load %arg3[%c8, %c0_48] : memref<16x32xf32, #tpu.memory_space<vmem>>, vector<2x32xf32>
    %259 = arith.mulf %258, %257 : vector<2x32xf32>
    %260 = arith.addf %211, %259 : vector<2x32xf32>
    %261 = vector.extract_strided_slice %5 {offsets = [1, 256], sizes = [1, 128], strides = [1, 1]} : vector<2x1024xf32> to vector<1x128xf32>
    %262 = vector.extract_strided_slice %5 {offsets = [1, 384], sizes = [1, 128], strides = [1, 1]} : vector<2x1024xf32> to vector<1x128xf32>
    %c1_i32_49 = arith.constant 1 : i32
    %263 = vector.broadcast %c1_i32_49 : i32 to vector<2x128xi32>
    %264 = arith.cmpi eq, %10, %263 : vector<2x128xi32>
    %265 = vector.shape_cast %262 : vector<1x128xf32> to vector<1x128xf32>
    %266 = vector.broadcast %265 : vector<1x128xf32> to vector<2x128xf32>
    %267 = vector.shape_cast %261 : vector<1x128xf32> to vector<1x128xf32>
    %268 = vector.broadcast %267 : vector<1x128xf32> to vector<2x128xf32>
    %269 = arith.select %264, %266, %268 : vector<2x128xi1>, vector<2x128xf32>
    %cst_50 = arith.constant dense<0.000000e+00> : vector<2x128xf32>
    %270 = tpu.matmul %237, %6, %cst_50 {dimension_numbers = #tpu.dot_dimension_numbers<[1], [0], [0], [1], [0, 0, 1, 1], [], []>} : vector<2x32xf32>, vector<32x128xf32>, vector<2x128xf32> -> vector<2x128xf32>
    %271 = arith.addf %269, %270 : vector<2x128xf32>
    %272 = arith.negf %271 : vector<2x128xf32>
    %273 = math.exp %272 : vector<2x128xf32>
    %cst_51 = arith.constant 1.000000e+00 : f32
    %274 = vector.broadcast %cst_51 : f32 to vector<2x128xf32>
    %275 = arith.addf %274, %273 : vector<2x128xf32>
    %276 = arith.divf %274, %275 : vector<2x128xf32>
    %277 = vector.extract_strided_slice %271 {offsets = [0, 64], sizes = [2, 32], strides = [1, 1]} : vector<2x128xf32> to vector<2x32xf32>
    %278 = math.tanh %277 : vector<2x32xf32>
    %279 = vector.extract_strided_slice %276 {offsets = [0, 32], sizes = [2, 32], strides = [1, 1]} : vector<2x128xf32> to vector<2x32xf32>
    %280 = arith.mulf %279, %234 : vector<2x32xf32>
    %281 = vector.extract_strided_slice %276 {offsets = [0, 0], sizes = [2, 32], strides = [1, 1]} : vector<2x128xf32> to vector<2x32xf32>
    %282 = arith.mulf %281, %278 : vector<2x32xf32>
    %283 = arith.addf %280, %282 : vector<2x32xf32>
    %284 = vector.extract_strided_slice %276 {offsets = [0, 96], sizes = [2, 32], strides = [1, 1]} : vector<2x128xf32> to vector<2x32xf32>
    %285 = math.tanh %283 : vector<2x32xf32>
    %286 = arith.mulf %284, %285 : vector<2x32xf32>
    %cst_52 = arith.constant dense<0.000000e+00> : vector<2x128xf32>
    %287 = tpu.matmul %286, %7, %cst_52 {dimension_numbers = #tpu.dot_dimension_numbers<[1], [0], [0], [1], [0, 0, 1, 1], [], []>} : vector<2x32xf32>, vector<32x128xf32>, vector<2x128xf32> -> vector<2x128xf32>
    %cst_53 = arith.constant dense<0.000000e+00> : vector<2x128xf32>
    %288 = tpu.matmul %257, %8, %cst_53 {dimension_numbers = #tpu.dot_dimension_numbers<[1], [0], [0], [1], [0, 0, 1, 1], [], []>} : vector<2x32xf32>, vector<32x128xf32>, vector<2x128xf32> -> vector<2x128xf32>
    %289 = arith.addf %287, %288 : vector<2x128xf32>
    %290 = vector.broadcast %9 : vector<1x128xf32> to vector<2x128xf32>
    %291 = arith.addf %289, %290 : vector<2x128xf32>
    %292 = arith.negf %291 : vector<2x128xf32>
    %293 = math.exp %292 : vector<2x128xf32>
    %cst_54 = arith.constant 1.000000e+00 : f32
    %294 = vector.broadcast %cst_54 : f32 to vector<2x128xf32>
    %295 = arith.addf %294, %293 : vector<2x128xf32>
    %296 = arith.divf %294, %295 : vector<2x128xf32>
    %297 = vector.extract_strided_slice %291 {offsets = [0, 64], sizes = [2, 32], strides = [1, 1]} : vector<2x128xf32> to vector<2x32xf32>
    %298 = math.tanh %297 : vector<2x32xf32>
    %299 = vector.extract_strided_slice %296 {offsets = [0, 32], sizes = [2, 32], strides = [1, 1]} : vector<2x128xf32> to vector<2x32xf32>
    %300 = arith.mulf %299, %254 : vector<2x32xf32>
    %301 = vector.extract_strided_slice %296 {offsets = [0, 0], sizes = [2, 32], strides = [1, 1]} : vector<2x128xf32> to vector<2x32xf32>
    %302 = arith.mulf %301, %298 : vector<2x32xf32>
    %303 = arith.addf %300, %302 : vector<2x32xf32>
    %304 = vector.extract_strided_slice %296 {offsets = [0, 96], sizes = [2, 32], strides = [1, 1]} : vector<2x128xf32> to vector<2x32xf32>
    %305 = math.tanh %303 : vector<2x32xf32>
    %306 = arith.mulf %304, %305 : vector<2x32xf32>
    %c10 = arith.constant 10 : index
    %c0_55 = arith.constant 0 : index
    %307 = vector.load %arg3[%c10, %c0_55] : memref<16x32xf32, #tpu.memory_space<vmem>>, vector<2x32xf32>
    %308 = arith.mulf %307, %306 : vector<2x32xf32>
    %309 = arith.addf %260, %308 : vector<2x32xf32>
    %310 = vector.extract_strided_slice %5 {offsets = [1, 512], sizes = [1, 128], strides = [1, 1]} : vector<2x1024xf32> to vector<1x128xf32>
    %311 = vector.extract_strided_slice %5 {offsets = [1, 640], sizes = [1, 128], strides = [1, 1]} : vector<2x1024xf32> to vector<1x128xf32>
    %c1_i32_56 = arith.constant 1 : i32
    %312 = vector.broadcast %c1_i32_56 : i32 to vector<2x128xi32>
    %313 = arith.cmpi eq, %10, %312 : vector<2x128xi32>
    %314 = vector.shape_cast %311 : vector<1x128xf32> to vector<1x128xf32>
    %315 = vector.broadcast %314 : vector<1x128xf32> to vector<2x128xf32>
    %316 = vector.shape_cast %310 : vector<1x128xf32> to vector<1x128xf32>
    %317 = vector.broadcast %316 : vector<1x128xf32> to vector<2x128xf32>
    %318 = arith.select %313, %315, %317 : vector<2x128xi1>, vector<2x128xf32>
    %cst_57 = arith.constant dense<0.000000e+00> : vector<2x128xf32>
    %319 = tpu.matmul %286, %6, %cst_57 {dimension_numbers = #tpu.dot_dimension_numbers<[1], [0], [0], [1], [0, 0, 1, 1], [], []>} : vector<2x32xf32>, vector<32x128xf32>, vector<2x128xf32> -> vector<2x128xf32>
    %320 = arith.addf %318, %319 : vector<2x128xf32>
    %321 = arith.negf %320 : vector<2x128xf32>
    %322 = math.exp %321 : vector<2x128xf32>
    %cst_58 = arith.constant 1.000000e+00 : f32
    %323 = vector.broadcast %cst_58 : f32 to vector<2x128xf32>
    %324 = arith.addf %323, %322 : vector<2x128xf32>
    %325 = arith.divf %323, %324 : vector<2x128xf32>
    %326 = vector.extract_strided_slice %320 {offsets = [0, 64], sizes = [2, 32], strides = [1, 1]} : vector<2x128xf32> to vector<2x32xf32>
    %327 = math.tanh %326 : vector<2x32xf32>
    %328 = vector.extract_strided_slice %325 {offsets = [0, 32], sizes = [2, 32], strides = [1, 1]} : vector<2x128xf32> to vector<2x32xf32>
    %329 = arith.mulf %328, %283 : vector<2x32xf32>
    %330 = vector.extract_strided_slice %325 {offsets = [0, 0], sizes = [2, 32], strides = [1, 1]} : vector<2x128xf32> to vector<2x32xf32>
    %331 = arith.mulf %330, %327 : vector<2x32xf32>
    %332 = arith.addf %329, %331 : vector<2x32xf32>
    %333 = vector.extract_strided_slice %325 {offsets = [0, 96], sizes = [2, 32], strides = [1, 1]} : vector<2x128xf32> to vector<2x32xf32>
    %334 = math.tanh %332 : vector<2x32xf32>
    %335 = arith.mulf %333, %334 : vector<2x32xf32>
    %cst_59 = arith.constant dense<0.000000e+00> : vector<2x128xf32>
    %336 = tpu.matmul %335, %7, %cst_59 {dimension_numbers = #tpu.dot_dimension_numbers<[1], [0], [0], [1], [0, 0, 1, 1], [], []>} : vector<2x32xf32>, vector<32x128xf32>, vector<2x128xf32> -> vector<2x128xf32>
    %cst_60 = arith.constant dense<0.000000e+00> : vector<2x128xf32>
    %337 = tpu.matmul %306, %8, %cst_60 {dimension_numbers = #tpu.dot_dimension_numbers<[1], [0], [0], [1], [0, 0, 1, 1], [], []>} : vector<2x32xf32>, vector<32x128xf32>, vector<2x128xf32> -> vector<2x128xf32>
    %338 = arith.addf %336, %337 : vector<2x128xf32>
    %339 = vector.broadcast %9 : vector<1x128xf32> to vector<2x128xf32>
    %340 = arith.addf %338, %339 : vector<2x128xf32>
    %341 = arith.negf %340 : vector<2x128xf32>
    %342 = math.exp %341 : vector<2x128xf32>
    %cst_61 = arith.constant 1.000000e+00 : f32
    %343 = vector.broadcast %cst_61 : f32 to vector<2x128xf32>
    %344 = arith.addf %343, %342 : vector<2x128xf32>
    %345 = arith.divf %343, %344 : vector<2x128xf32>
    %346 = vector.extract_strided_slice %340 {offsets = [0, 64], sizes = [2, 32], strides = [1, 1]} : vector<2x128xf32> to vector<2x32xf32>
    %347 = math.tanh %346 : vector<2x32xf32>
    %348 = vector.extract_strided_slice %345 {offsets = [0, 32], sizes = [2, 32], strides = [1, 1]} : vector<2x128xf32> to vector<2x32xf32>
    %349 = arith.mulf %348, %303 : vector<2x32xf32>
    %350 = vector.extract_strided_slice %345 {offsets = [0, 0], sizes = [2, 32], strides = [1, 1]} : vector<2x128xf32> to vector<2x32xf32>
    %351 = arith.mulf %350, %347 : vector<2x32xf32>
    %352 = arith.addf %349, %351 : vector<2x32xf32>
    %353 = vector.extract_strided_slice %345 {offsets = [0, 96], sizes = [2, 32], strides = [1, 1]} : vector<2x128xf32> to vector<2x32xf32>
    %354 = math.tanh %352 : vector<2x32xf32>
    %355 = arith.mulf %353, %354 : vector<2x32xf32>
    %c12 = arith.constant 12 : index
    %c0_62 = arith.constant 0 : index
    %356 = vector.load %arg3[%c12, %c0_62] : memref<16x32xf32, #tpu.memory_space<vmem>>, vector<2x32xf32>
    %357 = arith.mulf %356, %355 : vector<2x32xf32>
    %358 = arith.addf %309, %357 : vector<2x32xf32>
    %359 = vector.extract_strided_slice %5 {offsets = [1, 768], sizes = [1, 128], strides = [1, 1]} : vector<2x1024xf32> to vector<1x128xf32>
    %360 = vector.extract_strided_slice %5 {offsets = [1, 896], sizes = [1, 128], strides = [1, 1]} : vector<2x1024xf32> to vector<1x128xf32>
    %c1_i32_63 = arith.constant 1 : i32
    %361 = vector.broadcast %c1_i32_63 : i32 to vector<2x128xi32>
    %362 = arith.cmpi eq, %10, %361 : vector<2x128xi32>
    %363 = vector.shape_cast %360 : vector<1x128xf32> to vector<1x128xf32>
    %364 = vector.broadcast %363 : vector<1x128xf32> to vector<2x128xf32>
    %365 = vector.shape_cast %359 : vector<1x128xf32> to vector<1x128xf32>
    %366 = vector.broadcast %365 : vector<1x128xf32> to vector<2x128xf32>
    %367 = arith.select %362, %364, %366 : vector<2x128xi1>, vector<2x128xf32>
    %cst_64 = arith.constant dense<0.000000e+00> : vector<2x128xf32>
    %368 = tpu.matmul %335, %6, %cst_64 {dimension_numbers = #tpu.dot_dimension_numbers<[1], [0], [0], [1], [0, 0, 1, 1], [], []>} : vector<2x32xf32>, vector<32x128xf32>, vector<2x128xf32> -> vector<2x128xf32>
    %369 = arith.addf %367, %368 : vector<2x128xf32>
    %370 = arith.negf %369 : vector<2x128xf32>
    %371 = math.exp %370 : vector<2x128xf32>
    %cst_65 = arith.constant 1.000000e+00 : f32
    %372 = vector.broadcast %cst_65 : f32 to vector<2x128xf32>
    %373 = arith.addf %372, %371 : vector<2x128xf32>
    %374 = arith.divf %372, %373 : vector<2x128xf32>
    %375 = vector.extract_strided_slice %369 {offsets = [0, 64], sizes = [2, 32], strides = [1, 1]} : vector<2x128xf32> to vector<2x32xf32>
    %376 = math.tanh %375 : vector<2x32xf32>
    %377 = vector.extract_strided_slice %374 {offsets = [0, 32], sizes = [2, 32], strides = [1, 1]} : vector<2x128xf32> to vector<2x32xf32>
    %378 = arith.mulf %377, %332 : vector<2x32xf32>
    %379 = vector.extract_strided_slice %374 {offsets = [0, 0], sizes = [2, 32], strides = [1, 1]} : vector<2x128xf32> to vector<2x32xf32>
    %380 = arith.mulf %379, %376 : vector<2x32xf32>
    %381 = arith.addf %378, %380 : vector<2x32xf32>
    %382 = vector.extract_strided_slice %374 {offsets = [0, 96], sizes = [2, 32], strides = [1, 1]} : vector<2x128xf32> to vector<2x32xf32>
    %383 = math.tanh %381 : vector<2x32xf32>
    %384 = arith.mulf %382, %383 : vector<2x32xf32>
    %cst_66 = arith.constant dense<0.000000e+00> : vector<2x128xf32>
    %385 = tpu.matmul %384, %7, %cst_66 {dimension_numbers = #tpu.dot_dimension_numbers<[1], [0], [0], [1], [0, 0, 1, 1], [], []>} : vector<2x32xf32>, vector<32x128xf32>, vector<2x128xf32> -> vector<2x128xf32>
    %cst_67 = arith.constant dense<0.000000e+00> : vector<2x128xf32>
    %386 = tpu.matmul %355, %8, %cst_67 {dimension_numbers = #tpu.dot_dimension_numbers<[1], [0], [0], [1], [0, 0, 1, 1], [], []>} : vector<2x32xf32>, vector<32x128xf32>, vector<2x128xf32> -> vector<2x128xf32>
    %387 = arith.addf %385, %386 : vector<2x128xf32>
    %388 = vector.broadcast %9 : vector<1x128xf32> to vector<2x128xf32>
    %389 = arith.addf %387, %388 : vector<2x128xf32>
    %390 = arith.negf %389 : vector<2x128xf32>
    %391 = math.exp %390 : vector<2x128xf32>
    %cst_68 = arith.constant 1.000000e+00 : f32
    %392 = vector.broadcast %cst_68 : f32 to vector<2x128xf32>
    %393 = arith.addf %392, %391 : vector<2x128xf32>
    %394 = arith.divf %392, %393 : vector<2x128xf32>
    %395 = vector.extract_strided_slice %389 {offsets = [0, 64], sizes = [2, 32], strides = [1, 1]} : vector<2x128xf32> to vector<2x32xf32>
    %396 = math.tanh %395 : vector<2x32xf32>
    %397 = vector.extract_strided_slice %394 {offsets = [0, 32], sizes = [2, 32], strides = [1, 1]} : vector<2x128xf32> to vector<2x32xf32>
    %398 = arith.mulf %397, %352 : vector<2x32xf32>
    %399 = vector.extract_strided_slice %394 {offsets = [0, 0], sizes = [2, 32], strides = [1, 1]} : vector<2x128xf32> to vector<2x32xf32>
    %400 = arith.mulf %399, %396 : vector<2x32xf32>
    %401 = arith.addf %398, %400 : vector<2x32xf32>
    %402 = vector.extract_strided_slice %394 {offsets = [0, 96], sizes = [2, 32], strides = [1, 1]} : vector<2x128xf32> to vector<2x32xf32>
    %403 = math.tanh %401 : vector<2x32xf32>
    %404 = arith.mulf %402, %403 : vector<2x32xf32>
    %c14 = arith.constant 14 : index
    %c0_69 = arith.constant 0 : index
    %405 = vector.load %arg3[%c14, %c0_69] : memref<16x32xf32, #tpu.memory_space<vmem>>, vector<2x32xf32>
    %406 = arith.mulf %405, %404 : vector<2x32xf32>
    %407 = arith.addf %358, %406 : vector<2x32xf32>
    %c0_70 = arith.constant 0 : index
    %c0_71 = arith.constant 0 : index
    %408 = vector.load %arg6[%c0_70, %c0_71] : memref<33x32xf32, #tpu.memory_space<vmem>>, vector<32x32xf32>
    %c32_72 = arith.constant 32 : index
    %c0_73 = arith.constant 0 : index
    %409 = vector.load %arg6[%c32_72, %c0_73] : memref<33x32xf32, #tpu.memory_space<vmem>>, vector<1x32xf32>
    %cst_74 = arith.constant dense<0.000000e+00> : vector<2x32xf32>
    %410 = tpu.matmul %407, %408, %cst_74 {dimension_numbers = #tpu.dot_dimension_numbers<[1], [0], [0], [1], [0, 0, 1, 1], [], []>} : vector<2x32xf32>, vector<32x32xf32>, vector<2x32xf32> -> vector<2x32xf32>
    %411 = vector.broadcast %409 : vector<1x32xf32> to vector<2x32xf32>
    %412 = arith.addf %410, %411 : vector<2x32xf32>
    %cst_75 = arith.constant 0.000000e+00 : f32
    %413 = vector.broadcast %cst_75 : f32 to vector<2x32xf32>
    %414 = arith.maximumf %412, %413 : vector<2x32xf32>
    %c0_76 = arith.constant 0 : index
    %c0_77 = arith.constant 0 : index
    %415 = vector.load %arg7[%c0_76, %c0_77] : memref<36x128xf32, #tpu.memory_space<vmem>>, vector<32x128xf32>
    %c32_78 = arith.constant 32 : index
    %c0_79 = arith.constant 0 : index
    %416 = vector.load %arg7[%c32_78, %c0_79] : memref<36x128xf32, #tpu.memory_space<vmem>>, vector<3x128xf32>
    %c35 = arith.constant 35 : index
    %c0_80 = arith.constant 0 : index
    %417 = vector.load %arg7[%c35, %c0_80] : memref<36x128xf32, #tpu.memory_space<vmem>>, vector<1x128xf32>
    %cst_81 = arith.constant dense<0.000000e+00> : vector<2x128xf32>
    %418 = tpu.matmul %414, %415, %cst_81 {dimension_numbers = #tpu.dot_dimension_numbers<[1], [0], [0], [1], [0, 0, 1, 1], [], []>} : vector<2x32xf32>, vector<32x128xf32>, vector<2x128xf32> -> vector<2x128xf32>
    %c0_82 = arith.constant 0 : index
    %c0_83 = arith.constant 0 : index
    %419 = vector.load %arg2[%c0_82, %c0_83] : memref<2x3xf32, #tpu.memory_space<vmem>>, vector<2x3xf32>
    %cst_84 = arith.constant dense<0.000000e+00> : vector<2x128xf32>
    %420 = tpu.matmul %419, %416, %cst_84 {dimension_numbers = #tpu.dot_dimension_numbers<[1], [0], [0], [1], [0, 0, 1, 1], [], []>} : vector<2x3xf32>, vector<3x128xf32>, vector<2x128xf32> -> vector<2x128xf32>
    %421 = arith.addf %418, %420 : vector<2x128xf32>
    %422 = vector.broadcast %417 : vector<1x128xf32> to vector<2x128xf32>
    %423 = arith.addf %421, %422 : vector<2x128xf32>
    %424 = arith.negf %423 : vector<2x128xf32>
    %425 = math.exp %424 : vector<2x128xf32>
    %cst_85 = arith.constant 1.000000e+00 : f32
    %426 = vector.broadcast %cst_85 : f32 to vector<2x128xf32>
    %427 = arith.addf %426, %425 : vector<2x128xf32>
    %428 = arith.divf %426, %427 : vector<2x128xf32>
    %c0_86 = arith.constant 0 : index
    %c0_87 = arith.constant 0 : index
    %429 = vector.load %arg8[%c0_86, %c0_87] : memref<2x128xf32, #tpu.memory_space<vmem>>, vector<2x128xf32>
    tpu.vector_store %arg8[%c0_86, %c0_87], %428 {strides = array<i32>} : memref<2x128xf32, #tpu.memory_space<vmem>>, vector<2x128xf32>,
    return
  }
  func.func @transform_0(%arg0: i32) -> (i32, i32) {
    %c0_i32 = arith.constant 0 : i32
    %c0_i32_0 = arith.constant 0 : i32
    %c0_i32_1 = arith.constant 0 : i32
    return %c0_i32, %c0_i32_0 : i32, i32
  }
  func.func @transform_1(%arg0: i32) -> (i32, i32) {
    %c0_i32 = arith.constant 0 : i32
    %c0_i32_0 = arith.constant 0 : i32
    %c0_i32_1 = arith.constant 0 : i32
    return %c0_i32, %c0_i32_0 : i32, i32
  }
  func.func @transform_2(%arg0: i32) -> (i32, i32) {
    %c0_i32 = arith.constant 0 : i32
    %c0_i32_0 = arith.constant 0 : i32
    %c0_i32_1 = arith.constant 0 : i32
    return %c0_i32, %c0_i32_0 : i32, i32
  }
  func.func @transform_3(%arg0: i32) -> (i32, i32) {
    %c0_i32 = arith.constant 0 : i32
    %c0_i32_0 = arith.constant 0 : i32
    %c0_i32_1 = arith.constant 0 : i32
    return %c0_i32, %c0_i32_0 : i32, i32
  }
  func.func @transform_4(%arg0: i32) -> (i32, i32) {
    %c0_i32 = arith.constant 0 : i32
    %c0_i32_0 = arith.constant 0 : i32
    %c0_i32_1 = arith.constant 0 : i32
    return %c0_i32, %c0_i32_0 : i32, i32
  }
  func.func @transform_5(%arg0: i32) -> (i32, i32) {
    %c0_i32 = arith.constant 0 : i32
    %c0_i32_0 = arith.constant 0 : i32
    %c0_i32_1 = arith.constant 0 : i32
    return %c0_i32, %c0_i32_0 : i32, i32
  }
  func.func @transform_6(%arg0: i32) -> (i32, i32) {
    %c0_i32 = arith.constant 0 : i32
    %c0_i32_0 = arith.constant 0 : i32
    %c0_i32_1 = arith.constant 0 : i32
    return %c0_i32, %c0_i32_0 : i32, i32
  }
  func.func @transform_7(%arg0: i32) -> (i32, i32) {
    %c0_i32 = arith.constant 0 : i32
    %c0_i32_0 = arith.constant 0 : i32
    %c0_i32_1 = arith.constant 0 : i32
    return %c0_i32, %c0_i32_0 : i32, i32
  }
}

</mosaic_0001>

<bundles_post_ra>
// kernel: model_forward.1
= control target key start
LH: loop header
LB: loop body
LE: loop exit
PB: predicated region body
PF: predicated region fallthrough
CT: control target
= control target key end

     0   :  { %12 = vsyncpa [#allocation3], 0  ;;  %s4446_s0 = inlined_call_operand.vmem [shape: f32[2,24], index: 0, kind: input, shape index: {}]   ;;  %s4447_s1 = inlined_call_operand.vmem [shape: f32[2,3], index: 1, kind: input, shape index: {}]   ;;  %s4448_s2 = inlined_call_operand.vmem [shape: f32[16,32], index: 2, kind: input, shape index: {}]   ;;  %s4449_s3 = inlined_call_operand.vmem [shape: f32[25,1024], index: 3, kind: input, shape index: {}]   ;;  %s4450_s4 = inlined_call_operand.hbm [shape: f32[97,128], index: 4, kind: input, shape index: {}]   ;;  %s4451_s5 = inlined_call_operand.vmem [shape: f32[33,32], index: 5, kind: input, shape index: {}]   ;;  %s4452_s6 = inlined_call_operand.vmem [shape: f32[36,128], index: 6, kind: input, shape index: {}]   ;;  %s4453_s7 = inlined_call_operand.hbm [shape: f32[2,128], index: 7, kind: output, shape index: {}]  }
   0x1   :  { %13 = vsyncpa [#allocation4], 0  ;;  %s3789_s24 = smov [#allocation2]   ;;  %s3741_s28 = scalar_lea.hbm %s4450_s4, 1664 }
   0x2   :  { %s27_s25 = sshll.u32 %s3789_s24, 4  ;;  %p3742_p0 = scmp.ne.s32.totalorder %s4450_s4, %s3741_s28  ;;  %s28_s25 = int_to_ptr.vmem [resolvable:$true] %s27_s25 }
   0x3   :  { %p3745_p1 = scmp.lt.u32.totalorder %s3741_s28, %s4450_s4 }
   0x5   :  { %p3747_p2 = pnand %p3745_p1, %p3742_p0 }
   0x7   :  { %3750 = shalt.err (!%p3747_p2)
}
   0x8   :  { %s3751_s10 = scalar_lea.vmem %s28_s25, 1664  ;;  %p3756_p4 = scmp.lt.s32.totalorder %s28_s25, %s28_s25 }
   0x9   :  { %p3752_p3 = scmp.ne.s32.totalorder %s28_s25, %s3751_s10  ;;  %p3757_p5 = scmp.lt.s32.totalorder %s3751_s10, %s3751_s10 }
   0xb   :  { %p3758_p6 = por %p3757_p5, %p3756_p4 }
   0xd   :  { %p3759_p7 = pnand %p3758_p6, %p3752_p3 }
   0xf   :  { %3762 = shalt.err (!%p3759_p7)
}
  0x10   :  { %s3790_s11 = smov 128   ;;  %s3791_s12 = smov 8  }
  0x11   :  { %33 = dma.hbm_to_vmem [thread:$0]  %s4450_s4, 1664, %s28_s25, [#allocation3], %s3790_s11, %s3790_s11, %s3791_s12  }
  0x12   :  { %3785 = dma.done.wait [#allocation3], 1664  }
  0x13   :  { %3786 = vsyncadd [#allocation3], 4294965632  ;;  %v3792_v0 = vmov 0.0   ;;  %v43_v1 = vld [vmem:[%s4449_s3 + $0x8] sm:$0xff]  ;;  %v42_v3 = vld [vmem:[%s4449_s3] sm:$0xff]  ;;  %vm111_vm0 = vcmask 195584   ;;  %v71_v25 = vlaneseq }
  0x14   :  { %179 = vmatprep.mubr.f32.mxu0 %v3792_v0  ;;  %250 = vmatprep.mubr.f32.mxu1 %v3792_v0  ;;  %v51_v2 = vld [vmem:[%s4449_s3 + $0x48] sm:$0xff]  ;;  %v50_v5 = vld [vmem:[%s4449_s3 + $0x40] sm:$0xff]  ;;  %v401_v21 = vld [vmem:[#allocation2 + $0x10] sm:$0xff]  ;;  %v3793_v23 = vmov 0.0|0.0   ;;  %vm3794_vm1 = vmmov 0   ;;  %s3795_s20 = smov 64  }
  0x15   :  { %v3428_v4 = vpack.c.bf16 %v51_v2, %v43_v1  ;;  %v3430_v6 = vpack.c.bf16 %v50_v5, %v42_v3  ;;  %v59_v7 = vld [vmem:[%s4449_s3 + $0x88] sm:$0xff]  ;;  %v46_v10 = vld [vmem:[%s4449_s3 + $0x20] sm:$0xff]  ;;  %v402_v22 = vld [vmem:[#allocation2 + $0x18] sm:$0xff]  ;;  %v3912_v26 = vshrl.u32 %v71_v25, 7  ;;  %s3796_s4 = smov 32   ;;  %vm424_vm3 = vcmask 261120  }
  0x16   :  { %v47_v8 = vld [vmem:[%s4449_s3 + $0x28] sm:$0xff]  ;;  %v54_v11 = vld [vmem:[%s4449_s3 + $0x60] sm:$0xff]  ;;  %v3902_v24 = vpack.c.bf16 %v402_v22, %v401_v21  ;;  %v60_v21 = vld [vmem:[%s4449_s3 + $0x90] sm:$0xff]  ;;  %vm2779_vm4 = vcmask 1042432   ;;  %vm2775_vm5 = vcmask 23552  }
  0x17   :  { %v55_v9 = vld [vmem:[%s4449_s3 + $0x68] sm:$0xff]  ;;  %3429 = vmatprep.subr.bf16.mxu0 %v3428_v4  ;;  %v58_v12 = vld [vmem:[%s4449_s3 + $0x80] sm:$0xff]  ;;  %v3438_v15 = vpack.c.bf16 %v54_v11, %v46_v10  ;;  %v3923_v30 = vsub.s32 0, %v3912_v26  ;;  %v3926_v31 = vsub.s32 1, %v3912_v26  ;;  %v89_v34 = vsub.s32 4, %v3912_v26  ;;  %v44_v10 = vld [vmem:[%s4449_s3 + $0x10] sm:$0xff] }
  0x18   :  { %3431 = vmatpush1.bf16.msra.mxu0 %v3430_v6  ;;  %v3436_v13 = vpack.c.bf16 %v55_v9, %v47_v8  ;;  %v3885_v14 = vld [vmem:[%s4446_s0] sm:$0x3]  ;;  %v63_v16 = vld [vmem:[%s4449_s3 + $0xa8] sm:$0xff]  ;;  %v93_v36 = vsub.s32 5, %v3912_v26  ;;  %vm414_vm2 = vcmp.eq.s32.totalorder %v3912_v26, 1  ;;  %v45_v8 = vld [vmem:[%s4449_s3 + $0x18] sm:$0xff] }
  0x19   :  { %119 = vmatprep.subr.mxu0 %v59_v7  ;;  %v399_v17 = vld [vmem:[#allocation2] sm:$0xff]  ;;  %v400_v18 = vld [vmem:[#allocation2 + $0x8] sm:$0xff]  ;;  %v53_v9 = vld [vmem:[%s4449_s3 + $0x58] sm:$0xff] }
  0x1a   :  { %v62_v19 = vld [vmem:[%s4449_s3 + $0xa0] sm:$0xff]  ;;  %v3896_v20 = vpack.c.bf16 %v400_v18, %v399_v17  ;;  %v3432_v11 = vpack.c.bf16 %v53_v9, %v45_v8  ;;  %v57_v17 = vld [vmem:[%s4449_s3 + $0x78] sm:$0xff]  ;;  %v48_v18 = vld [vmem:[%s4449_s3 + $0x30] sm:$0xff] }
  0x1b   :  { %v2953_v27 = vld [vmem:[%s4449_s3 + $0xc0] ss:$8 sm:$0xf] }
  0x1c   :  { %120 = vmatpush1.msra.mxu0 %v58_v12  ;;  %v2954_v28 = vld [vmem:[%s4449_s3 + $0xc0] ss:$8 sm:$0xf0]  ;;  %3433 = vmatprep.subr.bf16.mxu1 %v3432_v11 }
  0x1d   :  { %2955 = vmatmul.mubr.msk.f32.vlgmr.msra.gmra.mrb[0].mxu0 %vm111_vm0, %v3885_v14  ;;  %3437 = vmatprep.subr.bf16.mxu0 %v3436_v13  ;;  %v3920_v29 = vor.u32 %v2954_v28, %v2953_v27  ;;  %v52_v12 = vld [vmem:[%s4449_s3 + $0x50] sm:$0xff]  ;;  %v403_v25 = vld [vmem:[#allocation2 + $0x20] sm:$0xff]  ;;  %v404_v27 = vld [vmem:[#allocation2 + $0x28] sm:$0xff] }
  0x1e   :  { %3439 = vmatpush1.bf16.msra.mxu0 %v3438_v15  ;;  %321 = vmatprep.mubr.f32.mxu0 %v3792_v0  ;;  %v3434_v13 = vpack.c.bf16 %v52_v12, %v44_v10  ;;  %v61_v15 = vld [vmem:[%s4449_s3 + $0x98] sm:$0xff] }
  0x1f   :  { %261 = vmatprep.subr.mxu0 %v63_v16  ;;  %v74_v32 = vrot.slane %v3920_v29, %v3923_v30  ;;  %v78_v33 = vrot.slane %v3920_v29, %v3926_v31  ;;  %v90_v42 = vrot.slane %v3920_v29, %v89_v34  ;;  %v94_v45 = vrot.slane %v3920_v29, %v93_v36  ;;  %v49_v16 = vld [vmem:[%s4449_s3 + $0x38] sm:$0xff]  ;;  %v407_v36 = vld [vmem:[#allocation2 + $0x40] sm:$0xff] }
  0x20   :  { %3435 = vmatpush1.bf16.msra.mxu1 %v3434_v13  ;;  %v3440_v22 = vpack.c.bf16 %v57_v17, %v49_v16  ;;  %v406_v34 = vld [vmem:[#allocation2 + $0x38] sm:$0xff] }
  0x21   :  { %190 = vmatprep.subr.mxu1 %v61_v15 }
  0x22   :  { %262 = vmatpush1.msra.mxu0 %v62_v19  ;;  %v56_v19 = vld [vmem:[%s4449_s3 + $0x70] sm:$0xff] }
  0x23   :  { %2957 = vmatmul.mubr.msk.f32.vlgmr.msra.gmra.mrb[2].mxu0 %vm111_vm0, %v3885_v14  ;;  %3444 = vmatprep.subr.bf16.mxu0 %v3793_v23  ;;  %v3442_v28 = vpack.c.bf16 %v56_v19, %v48_v18  ;;  %v4082_v18 = vld [vmem:[#allocation2 + $0x60] ss:$0 sm:$0xff] }
  0x24   :  { %3446 = vmatpush3.bf16.msra.mxu0 %v3896_v20  ;;  %3145 = vmatprep.mubr.msk.f32.mxu0 %vm3794_vm1, %v3792_v0 }
  0x25   :  { %3447 = vmatprep.subr.bf16.mxu0 %v3793_v23  ;;  %191 = vmatpush1.msra.mxu1 %v60_v21 }
  0x26   :  { %3441 = vmatprep.subr.bf16.mxu1 %v3440_v22  ;;  %2956 = vmatmul.mubr.msk.f32.vlgmr.msra.gmra.mrb[0].mxu1 %vm111_vm0, %v3885_v14 }
  0x27   :  { %3443 = vmatpush1.bf16.msra.mxu1 %v3442_v28  ;;  %392 = vmatprep.mubr.f32.mxu1 %v3792_v0 }
  0x28   :  { %3449 = vmatpush3.bf16.msra.mxu0 %v3902_v24 }
  0x29   :  { %3456 = vmatprep.subr.bf16.mxu0 %v3793_v23 }
  0x2b   :  { %3146 = vmatmul.mubr.f32.vlgmr.msra.gmra.mrb[4].mxu0 %v3792_v0 }
  0x2c   :  { %3167 = vmatprep.mubr.msk.f32.mxu0 %vm3794_vm1, %v3792_v0 }
  0xf0   :  { %v181_v35 = vpop.f32.mrb[0].mxu0 }
  0xf1   :  { %v182_v37 = vadd.f32 %v181_v35, %v74_v32  ;;  %v183_v38 = vpop.f32.mrb[1].mxu0  ;;  %v3998_v32 = vpack.c.bf16 %v404_v27, %v403_v25  ;;  %v65_v35 = vld [vmem:[%s4449_s3 + $0xb8] sm:$0xff] }
  0xf2   :  { %v184_v39 = vadd.f32 %v183_v38, %v78_v33  ;;  %v405_v33 = vld [vmem:[#allocation2 + $0x30] sm:$0xff]  ;;  %332 = vmatprep.subr.mxu1 %v65_v35 }
  0xf3   :  { %v422_v40 = vrot.slane %v182_v37, %v3923_v30  ;;  %v1560_v41 = vrot.slane %v182_v37, %v3926_v31  ;;  %3458 = vmatpush3.bf16.msra.mxu0 %v3998_v32  ;;  %v408_v37 = vld [vmem:[#allocation2 + $0x48] sm:$0xff]  ;;  %v4006_v38 = vpack.c.bf16 %v406_v34, %v405_v33 }
  0xf4   :  { %v418_v43 = vrot.slane %v184_v39, %v3923_v30  ;;  %v1556_v44 = vrot.slane %v184_v39, %v3926_v31  ;;  %3459 = vmatprep.subr.bf16.mxu0 %v3793_v23 }
  0xf6   :  { %v323_v46 = vpop.f32.mrb[2].mxu0  ;;  %v423_v47 = vsel %vm414_vm2, %v418_v43, %v422_v40  ;;  %v3945_v48 = vsel %vm414_vm2, %v1556_v44, %v1560_v41  ;;  %v64_v40 = vld [vmem:[%s4449_s3 + $0xb0] sm:$0xff]  ;;  %v4013_v41 = vpack.c.bf16 %v408_v37, %v407_v36  ;;  %v410_v43 = vld [vmem:[#allocation2 + $0x58] sm:$0xff] }
  0xf7   :  { %v324_v49 = vadd.f32 %v323_v46, %v90_v42  ;;  %v325_v50 = vpop.f32.mrb[3].mxu0  ;;  %v409_v42 = vld [vmem:[#allocation2 + $0x50] sm:$0xff]  ;;  %3461 = vmatpush3.bf16.msra.mxu0 %v4006_v38  ;;  %333 = vmatpush1.msra.mxu1 %v64_v40 }
  0xf8   :  { %v326_v51 = vadd.f32 %v325_v50, %v94_v45  ;;  %3468 = vmatprep.subr.bf16.mxu0 %v3793_v23  ;;  %3450 = vmatprep.subr.bf16.mxu1 %v3793_v23  ;;  %v4022_v44 = vpack.c.bf16 %v410_v43, %v409_v42 }
  0xf9   :  { %v994_v52 = vrot.slane %v324_v49, %v3923_v30  ;;  %v2126_v53 = vrot.slane %v324_v49, %v3926_v31  ;;  %2958 = vmatmul.mubr.msk.f32.vlgmr.msra.gmra.mrb[2].mxu1 %vm111_vm0, %v3885_v14  ;;  %v252_v46 = vpop.f32.mrb[0].mxu1 }
  0xfa   :  { %v990_v54 = vrot.slane %v326_v51, %v3923_v30  ;;  %v2122_v55 = vrot.slane %v326_v51, %v3926_v31  ;;  %3452 = vmatpush3.bf16.msra.mxu1 %v4013_v41  ;;  %3156 = vmatprep.mubr.msk.f32.mxu1 %vm3794_vm1, %v3792_v0 }
  0xfb   :  { %3453 = vmatprep.subr.bf16.mxu1 %v3793_v23 }
  0xfc   :  { %v3953_v56 = vsel %vm414_vm2, %v990_v54, %v994_v52  ;;  %v3957_v57 = vsel %vm414_vm2, %v2122_v55, %v2126_v53  ;;  %v81_v54 = vsub.s32 2, %v3912_v26  ;;  %v85_v55 = vsub.s32 3, %v3912_v26 }
  0xfe   :  { %v494_v58 = vpop.f32.mrb[4].mxu0  ;;  %3455 = vmatpush3.bf16.msra.mxu1 %v4022_v44 }
  0xff   :  { %v498_v59 = vadd.f32 %v494_v58, %v423_v47  ;;  %v3147_v60 = vpop.f32.mrb[5].mxu0  ;;  %3462 = vmatprep.subr.bf16.mxu1 %v3793_v23  ;;  %v254_v47 = vpop.f32.mrb[1].mxu1  ;;  %v82_v58 = vrot.slane %v3920_v29, %v81_v54 }
 0x100   :  { %v97_v60 = vsub.s32 6, %v3912_v26 }
 0x101   :  { %3609 = vtanh.f32 %v498_v59  ;;  %v2959_v62 = vmul.f32 -1.442695, %v498_v59  ;;  %3157 = vmatmul.mubr.f32.vlgmr.msra.gmra.mrb[4].mxu1 %v3792_v0  ;;  %v86_v59 = vrot.slane %v3920_v29, %v85_v55 }
 0x102   :  { %3464 = vmatpush3.bf16.msra.mxu1 %v3896_v20  ;;  %3178 = vmatprep.mubr.msk.f32.mxu1 %vm3794_vm1, %v3792_v0 }
 0x103   :  { %3611 = vpow2.f32 %v2959_v62  ;;  %3465 = vmatprep.subr.bf16.mxu1 %v3793_v23  ;;  %v253_v62 = vadd.f32 %v252_v46, %v82_v58 }
 0x106   :  { %3467 = vmatpush3.bf16.msra.mxu1 %v3902_v24 }
 0x107   :  { %3474 = vmatprep.subr.bf16.mxu1 %v3793_v23 }
 0x10b   :  { %v3610_v61 = vpop.eup %3609 }
 0x10c   :  { %508 = vrot.lane.b32.xlu0 %v3610_v61, %s3795_s20  ;;  %v101_v61 = vsub.s32 7, %v3912_v26 }
 0x10d   :  { %v3612_v63 = vpop.eup %3611 }
 0x10e   :  { %v502_v1 = vadd.f32 1.0, %v3612_v63  ;;  %v255_v63 = vadd.f32 %v254_v47, %v86_v59 }
 0x110   :  { %3613 = vrcp.f32 %v502_v1  ;;  %v98_v1 = vrot.slane %v3920_v29, %v97_v60 }
 0x11a   :  { %v3960_v2 = vpop.eup %3613 }
 0x11b   :  { %v506_v5 = vmul.f32 0.0, %v3960_v2 }
 0x17e   :  { %v509_v3 = vpop.permute.xlu0 %508 }
 0x17f   :  { %v511_v4 = vmul.f32 %v3960_v2, %v509_v3  ;;  %v711_v3 = vrot.slane %v253_v62, %v3923_v30 }
 0x181   :  { %513 = vrot.lane.b32.xlu0 %v511_v4, %s3796_s4  ;;  %v707_v4 = vrot.slane %v255_v63, %v3923_v30 }
 0x183   :  { %v712_v10 = vsel %vm414_vm2, %v707_v4, %v711_v3 }
 0x1cc   :  { %v394_v49 = vpop.f32.mrb[2].mxu1 }
 0x1cd   :  { %v396_v50 = vpop.f32.mrb[3].mxu1  ;;  %v395_v8 = vadd.f32 %v394_v49, %v98_v1 }
 0x1cf   :  { %v1277_v11 = vrot.slane %v395_v8, %v3923_v30  ;;  %v2409_v13 = vrot.slane %v395_v8, %v3926_v31 }
 0x1d4   :  { %v589_v51 = vpop.f32.mrb[4].mxu1 }
 0x1d5   :  { %v3158_v52 = vpop.f32.mrb[5].mxu1 }
 0x1f3   :  { %v514_v6 = vpop.permute.xlu0 %513 }
 0x1f4   :  { %v3965_v7 = vadd.f32 %v514_v6, %v506_v5  ;;  %v1843_v5 = vrot.slane %v253_v62, %v3926_v31  ;;  %v1839_v6 = vrot.slane %v255_v63, %v3926_v31 }
 0x1f6   :  { %3615 = vtanh.f32 %v3965_v7 }
 0x200   :  { %v3616_v39 = vpop.eup %3615 }
 0x201   :  { %519 = vrot.lane.b32.xlu1 %v3616_v39, %s3795_s20 }
 0x273   :  { %v520_v14 = vpop.permute.xlu1 %519 }
 0x274   :  { %v522_v45 = vmul.f32 %v3960_v2, %v520_v14  ;;  %v102_v2 = vrot.slane %v3920_v29, %v101_v61  ;;  %v4070_v29 = vsel %vm414_vm2, %v1839_v6, %v1843_v5 }
 0x276   :  { %594 = vrot.lane.b32.xlu1 %v522_v45, %s3796_s4  ;;  %v397_v9 = vadd.f32 %v396_v50, %v102_v2 }
 0x278   :  { %v1273_v12 = vrot.slane %v397_v9, %v3923_v30  ;;  %v2405_v15 = vrot.slane %v397_v9, %v3926_v31 }
 0x27a   :  { %v4076_v16 = vsel %vm414_vm2, %v1273_v12, %v1277_v11  ;;  %v4080_v17 = vsel %vm414_vm2, %v2405_v15, %v2409_v13 }
 0x2e8   :  { %v595_v53 = vpop.permute.xlu1 %594 }
 0x2e9   :  { %3168 = vmatmul.mubr.msk.f32.vlgmr.msra.gmra.mrb[6].mxu0 %vm424_vm3, %v595_v53  ;;  %3179 = vmatmul.mubr.msk.f32.vlgmr.msra.gmra.mrb[6].mxu1 %vm424_vm3, %v595_v53 }
 0x2ea   :  { %3476 = vmatpush3.bf16.msra.mxu1 %v3998_v32  ;;  %3470 = vmatpush3.bf16.msra.mxu0 %v4013_v41 }
 0x2eb   :  { %3477 = vmatprep.subr.bf16.mxu1 %v3793_v23  ;;  %3471 = vmatprep.subr.bf16.mxu0 %v3793_v23 }
 0x2ec   :  { %3200 = vmatprep.mubr.msk.f32.mxu1 %vm3794_vm1, %v3792_v0  ;;  %3189 = vmatprep.mubr.msk.f32.mxu0 %vm3794_vm1, %v3792_v0 }
 0x2ee   :  { %3479 = vmatpush3.bf16.msra.mxu1 %v4006_v38  ;;  %3473 = vmatpush3.bf16.msra.mxu0 %v4022_v44 }
 0x2ef   :  { %3480 = vmatprep.subr.bf16.mxu0 %v3793_v23  ;;  %3486 = vmatprep.subr.bf16.mxu1 %v3793_v23 }
 0x3bc   :  { %v664_v19 = vpop.f32.mrb[6].mxu0  ;;  %v779_v30 = vpop.f32.mrb[6].mxu1 }
 0x3bd   :  { %v665_v21 = vadd.f32 %v664_v19, %v589_v51  ;;  %v783_v22 = vadd.f32 %v779_v30, %v712_v10  ;;  %v3169_v25 = vpop.f32.mrb[7].mxu0  ;;  %v3180_v27 = vpop.f32.mrb[7].mxu1 }
 0x3bf   :  { %v672_v28 = vadd.f32 %v4082_v18, %v665_v21  ;;  %3617 = vtanh.f32 %v783_v22  ;;  %v2964_v26 = vmul.f32 -1.442695, %v783_v22 }
 0x3c1   :  { %3619 = vtanh.f32 %v672_v28  ;;  %v2962_v34 = vmul.f32 -1.442695, %v672_v28 }
 0x3c2   :  { %3621 = vpow2.f32 %v2964_v26 }
 0x3c3   :  { %3623 = vpow2.f32 %v2962_v34 }
 0x3c9   :  { %v3618_v31 = vpop.eup %3617 }
 0x3ca   :  { %793 = vrot.lane.b32.xlu1 %v3618_v31, %s3795_s20 }
 0x3cb   :  { %v3620_v33 = vpop.eup %3619 }
 0x3cc   :  { %682 = vrot.lane.b32.xlu0 %v3620_v33, %s3795_s20  ;;  %v3622_v35 = vpop.eup %3621 }
 0x3cd   :  { %v3624_v36 = vpop.eup %3623  ;;  %v787_v37 = vadd.f32 1.0, %v3622_v35 }
 0x3ce   :  { %v676_v39 = vadd.f32 1.0, %v3624_v36 }
 0x3cf   :  { %3625 = vrcp.f32 %v787_v37 }
 0x3d0   :  { %3627 = vrcp.f32 %v676_v39 }
 0x3d9   :  { %v3626_v40 = vpop.eup %3625 }
 0x3da   :  { %v3628_v14 = vpop.eup %3627  ;;  %v791_v47 = vmul.f32 %v3626_v40, %v3965_v7 }
 0x3db   :  { %v680_v51 = vmul.f32 0.0, %v3628_v14 }
 0x43c   :  { %v794_v42 = vpop.permute.xlu1 %793 }
 0x43d   :  { %v796_v43 = vmul.f32 %v3626_v40, %v794_v42 }
 0x43e   :  { %v683_v45 = vpop.permute.xlu0 %682 }
 0x43f   :  { %v685_v46 = vmul.f32 %v3628_v14, %v683_v45  ;;  %798 = vrot.lane.b32.xlu1 %v796_v43, %s3796_s4 }
 0x441   :  { %687 = vrot.lane.b32.xlu0 %v685_v46, %s3796_s4 }
 0x4b1   :  { %v799_v49 = vpop.permute.xlu1 %798 }
 0x4b2   :  { %v4090_v50 = vadd.f32 %v799_v49, %v791_v47 }
 0x4b3   :  { %v688_v52 = vpop.permute.xlu0 %687 }
 0x4b4   :  { %3629 = vtanh.f32 %v4090_v50  ;;  %v4093_v53 = vadd.f32 %v688_v52, %v680_v51 }
 0x4b6   :  { %3631 = vtanh.f32 %v4093_v53 }
 0x4be   :  { %v3630_v54 = vpop.eup %3629 }
 0x4bf   :  { %804 = vrot.lane.b32.xlu1 %v3630_v54, %s3795_s20 }
 0x4c0   :  { %v3632_v55 = vpop.eup %3631 }
 0x4c1   :  { %693 = vrot.lane.b32.xlu0 %v3632_v55, %s3795_s20 }
 0x531   :  { %v805_v58 = vpop.permute.xlu1 %804 }
 0x532   :  { %v807_v59 = vmul.f32 %v3626_v40, %v805_v58 }
 0x533   :  { %v694_v7 = vpop.permute.xlu0 %693 }
 0x534   :  { %v696_v60 = vmul.f32 %v3628_v14, %v694_v7  ;;  %881 = vrot.lane.b32.xlu1 %v807_v59, %s3796_s4 }
 0x536   :  { %699 = vrot.lane.b32.xlu0 %v696_v60, %s3796_s4 }
 0x5a6   :  { %v882_v61 = vpop.permute.xlu1 %881 }
 0x5a7   :  { %3201 = vmatmul.mubr.msk.f32.vlgmr.msra.gmra.mrb[8].mxu1 %vm424_vm3, %v882_v61 }
 0x5a8   :  { %v4101_v62 = vpop.permute.xlu0 %699  ;;  %3488 = vmatpush3.bf16.msra.mxu1 %v4013_v41  ;;  %3222 = vmatprep.mubr.msk.f32.mxu1 %vm3794_vm1, %v3792_v0 }
 0x5a9   :  { %3190 = vmatmul.mubr.msk.f32.vlgmr.msra.gmra.mrb[8].mxu0 %vm424_vm3, %v4101_v62  ;;  %3489 = vmatprep.subr.bf16.mxu1 %v3793_v23 }
 0x5aa   :  { %3482 = vmatpush3.bf16.msra.mxu0 %v3896_v20  ;;  %3211 = vmatprep.mubr.msk.f32.mxu0 %vm3794_vm1, %v3792_v0 }
 0x5ab   :  { %3483 = vmatprep.subr.bf16.mxu0 %v3793_v23 }
 0x5ac   :  { %3491 = vmatpush3.bf16.msra.mxu1 %v4022_v44 }
 0x5ad   :  { %3498 = vmatprep.subr.bf16.mxu1 %v3793_v23 }
 0x5ae   :  { %3485 = vmatpush3.bf16.msra.mxu0 %v3902_v24 }
 0x5af   :  { %3492 = vmatprep.subr.bf16.mxu0 %v3793_v23 }
 0x5b1   :  { %3212 = vmatmul.mubr.msk.f32.vlgmr.msra.gmra.mrb[10].mxu0 %vm424_vm3, %v882_v61 }
 0x5b2   :  { %3494 = vmatpush3.bf16.msra.mxu0 %v3998_v32  ;;  %3233 = vmatprep.mubr.msk.f32.mxu0 %vm3794_vm1, %v3792_v0 }
 0x5b3   :  { %3495 = vmatprep.subr.bf16.mxu0 %v3793_v23 }
 0x5b6   :  { %3497 = vmatpush3.bf16.msra.mxu0 %v4006_v38 }
 0x5b7   :  { %3504 = vmatprep.subr.bf16.mxu0 %v3793_v23 }
 0x67a   :  { %v951_v63 = vpop.f32.mrb[8].mxu1 }
 0x67b   :  { %v3202_v1 = vpop.f32.mrb[9].mxu1 }
 0x67c   :  { %v876_v2 = vpop.f32.mrb[8].mxu0 }
 0x67d   :  { %v952_v3 = vadd.f32 %v951_v63, %v876_v2  ;;  %v3191_v4 = vpop.f32.mrb[9].mxu0 }
 0x67f   :  { %v955_v5 = vadd.f32 %v4082_v18, %v952_v3 }
 0x681   :  { %3633 = vtanh.f32 %v955_v5  ;;  %v2967_v12 = vmul.f32 -1.442695, %v955_v5 }
 0x684   :  { %v1062_v6 = vpop.f32.mrb[10].mxu0 }
 0x685   :  { %v1066_v8 = vadd.f32 %v1062_v6, %v3953_v56  ;;  %v3213_v9 = vpop.f32.mrb[11].mxu0 }
 0x687   :  { %3635 = vtanh.f32 %v1066_v8  ;;  %v2969_v13 = vmul.f32 -1.442695, %v1066_v8 }
 0x688   :  { %3637 = vpow2.f32 %v2967_v12 }
 0x689   :  { %3639 = vpow2.f32 %v2969_v13 }
 0x68b   :  { %v3634_v10 = vpop.eup %3633 }
 0x68c   :  { %965 = vrot.lane.b32.xlu0 %v3634_v10, %s3795_s20 }
 0x691   :  { %v3636_v11 = vpop.eup %3635 }
 0x692   :  { %1076 = vrot.lane.b32.xlu1 %v3636_v11, %s3795_s20  ;;  %v3638_v15 = vpop.eup %3637 }
 0x693   :  { %v959_v19 = vadd.f32 1.0, %v3638_v15  ;;  %v3640_v30 = vpop.eup %3639 }
 0x694   :  { %v1070_v21 = vadd.f32 1.0, %v3640_v30 }
 0x695   :  { %3641 = vrcp.f32 %v959_v19 }
 0x696   :  { %3643 = vrcp.f32 %v1070_v21 }
 0x69f   :  { %v3642_v22 = vpop.eup %3641 }
 0x6a0   :  { %v3644_v27 = vpop.eup %3643  ;;  %v963_v33 = vmul.f32 %v3642_v22, %v4093_v53 }
 0x6a1   :  { %v1074_v35 = vmul.f32 %v3644_v27, %v4090_v50 }
 0x6fe   :  { %v966_v56 = vpop.permute.xlu0 %965 }
 0x6ff   :  { %v968_v25 = vmul.f32 %v3642_v22, %v966_v56 }
 0x701   :  { %970 = vrot.lane.b32.xlu0 %v968_v25, %s3796_s4 }
 0x704   :  { %v1077_v28 = vpop.permute.xlu1 %1076 }
 0x705   :  { %v1079_v31 = vmul.f32 %v3644_v27, %v1077_v28 }
 0x707   :  { %1081 = vrot.lane.b32.xlu1 %v1079_v31, %s3796_s4 }
 0x773   :  { %v971_v26 = vpop.permute.xlu0 %970 }
 0x774   :  { %v4131_v34 = vadd.f32 %v971_v26, %v963_v33 }
 0x776   :  { %3645 = vtanh.f32 %v4131_v34 }
 0x779   :  { %v1082_v36 = vpop.permute.xlu1 %1081 }
 0x77a   :  { %v4135_v37 = vadd.f32 %v1082_v36, %v1074_v35 }
 0x77c   :  { %3647 = vtanh.f32 %v4135_v37 }
 0x780   :  { %v3646_v39 = vpop.eup %3645 }
 0x781   :  { %976 = vrot.lane.b32.xlu0 %v3646_v39, %s3795_s20 }
 0x786   :  { %v3648_v40 = vpop.eup %3647 }
 0x787   :  { %1087 = vrot.lane.b32.xlu1 %v3648_v40, %s3795_s20 }
 0x7f3   :  { %v977_v42 = vpop.permute.xlu0 %976 }
 0x7f4   :  { %v979_v43 = vmul.f32 %v3642_v22, %v977_v42 }
 0x7f6   :  { %982 = vrot.lane.b32.xlu0 %v979_v43, %s3796_s4 }
 0x7f9   :  { %v1088_v14 = vpop.permute.xlu1 %1087 }
 0x7fa   :  { %v1090_v45 = vmul.f32 %v3644_v27, %v1088_v14 }
 0x7fc   :  { %1164 = vrot.lane.b32.xlu1 %v1090_v45, %s3796_s4 }
 0x868   :  { %v4142_v46 = vpop.permute.xlu0 %982 }
 0x869   :  { %3223 = vmatmul.mubr.msk.f32.vlgmr.msra.gmra.mrb[10].mxu1 %vm424_vm3, %v4142_v46 }
 0x86a   :  { %3500 = vmatpush3.bf16.msra.mxu1 %v3896_v20  ;;  %3244 = vmatprep.mubr.msk.f32.mxu1 %vm3794_vm1, %v3792_v0 }
 0x86b   :  { %3501 = vmatprep.subr.bf16.mxu1 %v3793_v23 }
 0x86e   :  { %3503 = vmatpush3.bf16.msra.mxu1 %v3902_v24  ;;  %v1165_v47 = vpop.permute.xlu1 %1164 }
 0x86f   :  { %3234 = vmatmul.mubr.msk.f32.vlgmr.msra.gmra.mrb[12].mxu0 %vm424_vm3, %v1165_v47  ;;  %3510 = vmatprep.subr.bf16.mxu1 %v3793_v23 }
 0x870   :  { %3506 = vmatpush3.bf16.msra.mxu0 %v4013_v41  ;;  %3255 = vmatprep.mubr.msk.f32.mxu0 %vm3794_vm1, %v3792_v0 }
 0x871   :  { %3245 = vmatmul.mubr.msk.f32.vlgmr.msra.gmra.mrb[12].mxu1 %vm424_vm3, %v1165_v47  ;;  %3507 = vmatprep.subr.bf16.mxu0 %v3793_v23 }
 0x872   :  { %3512 = vmatpush3.bf16.msra.mxu1 %v3998_v32  ;;  %3266 = vmatprep.mubr.msk.f32.mxu1 %vm3794_vm1, %v3792_v0 }
 0x873   :  { %3513 = vmatprep.subr.bf16.mxu1 %v3793_v23 }
 0x874   :  { %3509 = vmatpush3.bf16.msra.mxu0 %v4022_v44 }
 0x875   :  { %3516 = vmatprep.subr.bf16.mxu0 %v3793_v23 }
 0x876   :  { %3515 = vmatpush3.bf16.msra.mxu1 %v4006_v38 }
 0x877   :  { %3522 = vmatprep.subr.bf16.mxu1 %v3793_v23 }
 0x93c   :  { %v1159_v49 = vpop.f32.mrb[10].mxu1 }
 0x93d   :  { %v3224_v50 = vpop.f32.mrb[11].mxu1 }
 0x942   :  { %v1234_v51 = vpop.f32.mrb[12].mxu0 }
 0x943   :  { %v1235_v52 = vadd.f32 %v1234_v51, %v1159_v49  ;;  %v3235_v53 = vpop.f32.mrb[13].mxu0 }
 0x944   :  { %v1345_v54 = vpop.f32.mrb[12].mxu1 }
 0x945   :  { %v1238_v55 = vadd.f32 %v4082_v18, %v1235_v52  ;;  %v1349_v58 = vadd.f32 %v1345_v54, %v4076_v16  ;;  %v3246_v59 = vpop.f32.mrb[13].mxu1 }
 0x947   :  { %3649 = vtanh.f32 %v1238_v55  ;;  %v2972_v61 = vmul.f32 -1.442695, %v1238_v55  ;;  %v2974_v63 = vmul.f32 -1.442695, %v1349_v58 }
 0x948   :  { %3651 = vtanh.f32 %v1349_v58 }
 0x949   :  { %3653 = vpow2.f32 %v2972_v61 }
 0x94a   :  { %3655 = vpow2.f32 %v2974_v63 }
 0x951   :  { %v3650_v7 = vpop.eup %3649 }
 0x952   :  { %v3652_v60 = vpop.eup %3651  ;;  %1248 = vrot.lane.b32.xlu0 %v3650_v7, %s3795_s20 }
 0x953   :  { %1359 = vrot.lane.b32.xlu1 %v3652_v60, %s3795_s20  ;;  %v3654_v1 = vpop.eup %3653 }
 0x954   :  { %v3656_v2 = vpop.eup %3655  ;;  %v1242_v3 = vadd.f32 1.0, %v3654_v1 }
 0x955   :  { %v1353_v4 = vadd.f32 1.0, %v3656_v2 }
 0x956   :  { %3657 = vrcp.f32 %v1242_v3 }
 0x957   :  { %3659 = vrcp.f32 %v1353_v4 }
 0x960   :  { %v3658_v16 = vpop.eup %3657 }
 0x961   :  { %v3660_v6 = vpop.eup %3659  ;;  %v1246_v11 = vmul.f32 %v3658_v16, %v4131_v34 }
 0x962   :  { %v1357_v12 = vmul.f32 %v3660_v6, %v4135_v37 }
 0x9c4   :  { %v1249_v5 = vpop.permute.xlu0 %1248 }
 0x9c5   :  { %v1360_v8 = vpop.permute.xlu1 %1359  ;;  %v1251_v9 = vmul.f32 %v3658_v16, %v1249_v5 }
 0x9c6   :  { %v1362_v10 = vmul.f32 %v3660_v6, %v1360_v8 }
 0x9c7   :  { %1253 = vrot.lane.b32.xlu0 %v1251_v9, %s3796_s4 }
 0x9c8   :  { %1364 = vrot.lane.b32.xlu1 %v1362_v10, %s3796_s4 }
 0xa39   :  { %v1254_v13 = vpop.permute.xlu0 %1253 }
 0xa3a   :  { %v1365_v15 = vpop.permute.xlu1 %1364  ;;  %v4174_v19 = vadd.f32 %v1254_v13, %v1246_v11 }
 0xa3b   :  { %v4176_v30 = vadd.f32 %v1365_v15, %v1357_v12 }
 0xa3c   :  { %3661 = vtanh.f32 %v4174_v19 }
 0xa3d   :  { %3663 = vtanh.f32 %v4176_v30 }
 0xa46   :  { %v3662_v21 = vpop.eup %3661 }
 0xa47   :  { %v3664_v22 = vpop.eup %3663  ;;  %1259 = vrot.lane.b32.xlu0 %v3662_v21, %s3795_s20 }
 0xa48   :  { %1370 = vrot.lane.b32.xlu1 %v3664_v22, %s3795_s20 }
 0xab9   :  { %v1260_v56 = vpop.permute.xlu0 %1259 }
 0xaba   :  { %v1371_v25 = vpop.permute.xlu1 %1370  ;;  %v1262_v27 = vmul.f32 %v3658_v16, %v1260_v56 }
 0xabb   :  { %v1373_v28 = vmul.f32 %v3660_v6, %v1371_v25 }
 0xabc   :  { %1265 = vrot.lane.b32.xlu0 %v1262_v27, %s3796_s4 }
 0xabd   :  { %1447 = vrot.lane.b32.xlu1 %v1373_v28, %s3796_s4 }
 0xb2e   :  { %v4184_v31 = vpop.permute.xlu0 %1265 }
 0xb2f   :  { %v1448_v33 = vpop.permute.xlu1 %1447  ;;  %3256 = vmatmul.mubr.msk.f32.vlgmr.msra.gmra.mrb[14].mxu0 %vm424_vm3, %v4184_v31 }
 0xb30   :  { %3267 = vmatmul.mubr.msk.f32.vlgmr.msra.gmra.mrb[14].mxu1 %vm424_vm3, %v1448_v33  ;;  %3518 = vmatpush3.bf16.msra.mxu0 %v3896_v20 }
 0xb31   :  { %3519 = vmatprep.subr.bf16.mxu0 %v3793_v23  ;;  %3277 = vmatprep.mubr.msk.f32.mxu0 %vm3794_vm1, %v3792_v0 }
 0xb32   :  { %3524 = vmatpush3.bf16.msra.mxu1 %v4013_v41  ;;  %3288 = vmatprep.mubr.msk.f32.mxu1 %vm3794_vm1, %v3792_v0 }
 0xb33   :  { %3525 = vmatprep.subr.bf16.mxu1 %v3793_v23 }
 0xb34   :  { %3521 = vmatpush3.bf16.msra.mxu0 %v3902_v24 }
 0xb35   :  { %3528 = vmatprep.subr.bf16.mxu0 %v3793_v23 }
 0xb36   :  { %3527 = vmatpush3.bf16.msra.mxu1 %v4022_v44 }
 0xb37   :  { %3278 = vmatmul.mubr.msk.f32.vlgmr.msra.gmra.mrb[16].mxu0 %vm424_vm3, %v1448_v33  ;;  %3534 = vmatprep.subr.bf16.mxu1 %v3793_v23 }
 0xb38   :  { %3530 = vmatpush3.bf16.msra.mxu0 %v3998_v32  ;;  %3299 = vmatprep.mubr.msk.f32.mxu0 %vm3794_vm1, %v3792_v0 }
 0xb39   :  { %3531 = vmatprep.subr.bf16.mxu0 %v3793_v23 }
 0xb3c   :  { %3533 = vmatpush3.bf16.msra.mxu0 %v4006_v38 }
 0xb3d   :  { %3540 = vmatprep.subr.bf16.mxu0 %v3793_v23 }
 0xc02   :  { %v1442_v26 = vpop.f32.mrb[14].mxu0 }
 0xc03   :  { %v1517_v34 = vpop.f32.mrb[14].mxu1  ;;  %v3257_v35 = vpop.f32.mrb[15].mxu0 }
 0xc04   :  { %v1518_v36 = vadd.f32 %v1517_v34, %v1442_v26  ;;  %v3268_v37 = vpop.f32.mrb[15].mxu1 }
 0xc06   :  { %v1521_v39 = vadd.f32 %v4082_v18, %v1518_v36 }
 0xc08   :  { %3665 = vtanh.f32 %v1521_v39  ;;  %v2977_v47 = vmul.f32 -1.442695, %v1521_v39 }
 0xc0a   :  { %v1628_v40 = vpop.f32.mrb[16].mxu0 }
 0xc0b   :  { %v1632_v42 = vadd.f32 %v1628_v40, %v3945_v48  ;;  %v3279_v43 = vpop.f32.mrb[17].mxu0 }
 0xc0d   :  { %3667 = vtanh.f32 %v1632_v42  ;;  %v2979_v49 = vmul.f32 -1.442695, %v1632_v42 }
 0xc0e   :  { %3669 = vpow2.f32 %v2977_v47 }
 0xc0f   :  { %3671 = vpow2.f32 %v2979_v49 }
 0xc12   :  { %v3666_v14 = vpop.eup %3665 }
 0xc13   :  { %1531 = vrot.lane.b32.xlu0 %v3666_v14, %s3795_s20 }
 0xc17   :  { %v3668_v45 = vpop.eup %3667 }
 0xc18   :  { %1642 = vrot.lane.b32.xlu1 %v3668_v45, %s3795_s20  ;;  %v3670_v50 = vpop.eup %3669 }
 0xc19   :  { %v1525_v51 = vadd.f32 1.0, %v3670_v50  ;;  %v3672_v52 = vpop.eup %3671 }
 0xc1a   :  { %v1636_v53 = vadd.f32 1.0, %v3672_v52 }
 0xc1b   :  { %3673 = vrcp.f32 %v1525_v51 }
 0xc1c   :  { %3675 = vrcp.f32 %v1636_v53 }
 0xc25   :  { %v3674_v54 = vpop.eup %3673 }
 0xc26   :  { %v3676_v58 = vpop.eup %3675  ;;  %v1529_v60 = vmul.f32 %v3674_v54, %v4174_v19 }
 0xc27   :  { %v1640_v1 = vmul.f32 %v3676_v58, %v4176_v30 }
 0xc85   :  { %v1532_v48 = vpop.permute.xlu0 %1531 }
 0xc86   :  { %v1534_v55 = vmul.f32 %v3674_v54, %v1532_v48 }
 0xc88   :  { %1536 = vrot.lane.b32.xlu0 %v1534_v55, %s3796_s4 }
 0xc8a   :  { %v1643_v59 = vpop.permute.xlu1 %1642 }
 0xc8b   :  { %v1645_v7 = vmul.f32 %v3676_v58, %v1643_v59 }
 0xc8d   :  { %1647 = vrot.lane.b32.xlu1 %v1645_v7, %s3796_s4 }
 0xcfa   :  { %v1537_v61 = vpop.permute.xlu0 %1536 }
 0xcfb   :  { %v4215_v63 = vadd.f32 %v1537_v61, %v1529_v60 }
 0xcfd   :  { %3677 = vtanh.f32 %v4215_v63 }
 0xcff   :  { %v1648_v2 = vpop.permute.xlu1 %1647 }
 0xd00   :  { %v4219_v3 = vadd.f32 %v1648_v2, %v1640_v1 }
 0xd02   :  { %3679 = vtanh.f32 %v4219_v3 }
 0xd07   :  { %v3678_v4 = vpop.eup %3677 }
 0xd08   :  { %1542 = vrot.lane.b32.xlu0 %v3678_v4, %s3795_s20 }
 0xd0c   :  { %v3680_v16 = vpop.eup %3679 }
 0xd0d   :  { %1653 = vrot.lane.b32.xlu1 %v3680_v16, %s3795_s20 }
 0xd7a   :  { %v1543_v5 = vpop.permute.xlu0 %1542 }
 0xd7b   :  { %v1545_v6 = vmul.f32 %v3674_v54, %v1543_v5 }
 0xd7d   :  { %1548 = vrot.lane.b32.xlu0 %v1545_v6, %s3796_s4 }
 0xd7f   :  { %v1654_v8 = vpop.permute.xlu1 %1653 }
 0xd80   :  { %v1656_v9 = vmul.f32 %v3676_v58, %v1654_v8 }
 0xd82   :  { %1730 = vrot.lane.b32.xlu1 %v1656_v9, %s3796_s4 }
 0xdef   :  { %v4226_v10 = vpop.permute.xlu0 %1548 }
 0xdf0   :  { %3289 = vmatmul.mubr.msk.f32.vlgmr.msra.gmra.mrb[16].mxu1 %vm424_vm3, %v4226_v10 }
 0xdf1   :  { %3536 = vmatpush3.bf16.msra.mxu1 %v3896_v20  ;;  %3310 = vmatprep.mubr.msk.f32.mxu1 %vm3794_vm1, %v3792_v0 }
 0xdf2   :  { %3537 = vmatprep.subr.bf16.mxu1 %v3793_v23 }
 0xdf4   :  { %v1731_v11 = vpop.permute.xlu1 %1730 }
 0xdf5   :  { %3539 = vmatpush3.bf16.msra.mxu1 %v3902_v24  ;;  %3300 = vmatmul.mubr.msk.f32.vlgmr.msra.gmra.mrb[18].mxu0 %vm424_vm3, %v1731_v11 }
 0xdf6   :  { %3542 = vmatpush3.bf16.msra.mxu0 %v4013_v41  ;;  %3546 = vmatprep.subr.bf16.mxu1 %v3793_v23 }
 0xdf7   :  { %3543 = vmatprep.subr.bf16.mxu0 %v3793_v23  ;;  %3321 = vmatprep.mubr.msk.f32.mxu0 %vm3794_vm1, %v3792_v0 }
 0xdf8   :  { %3311 = vmatmul.mubr.msk.f32.vlgmr.msra.gmra.mrb[18].mxu1 %vm424_vm3, %v1731_v11 }
 0xdf9   :  { %3548 = vmatpush3.bf16.msra.mxu1 %v3998_v32  ;;  %3332 = vmatprep.mubr.msk.f32.mxu1 %vm3794_vm1, %v3792_v0 }
 0xdfa   :  { %3545 = vmatpush3.bf16.msra.mxu0 %v4022_v44  ;;  %3549 = vmatprep.subr.bf16.mxu1 %v3793_v23 }
 0xdfb   :  { %3552 = vmatprep.subr.bf16.mxu0 %v3793_v23 }
 0xdfd   :  { %3551 = vmatpush3.bf16.msra.mxu1 %v4006_v38 }
 0xdfe   :  { %3558 = vmatprep.subr.bf16.mxu1 %v3793_v23 }
 0xec3   :  { %v1725_v12 = vpop.f32.mrb[16].mxu1 }
 0xec4   :  { %v3290_v13 = vpop.f32.mrb[17].mxu1 }
 0xec8   :  { %v1800_v15 = vpop.f32.mrb[18].mxu0 }
 0xec9   :  { %v1801_v19 = vadd.f32 %v1800_v15, %v1725_v12  ;;  %v3301_v30 = vpop.f32.mrb[19].mxu0 }
 0xecb   :  { %v1804_v21 = vadd.f32 %v4082_v18, %v1801_v19  ;;  %v1911_v22 = vpop.f32.mrb[18].mxu1 }
 0xecc   :  { %v1915_v56 = vadd.f32 %v1911_v22, %v4070_v29  ;;  %v3312_v25 = vpop.f32.mrb[19].mxu1 }
 0xecd   :  { %3681 = vtanh.f32 %v1804_v21  ;;  %v2982_v33 = vmul.f32 -1.442695, %v1804_v21 }
 0xece   :  { %3683 = vtanh.f32 %v1915_v56  ;;  %v2984_v26 = vmul.f32 -1.442695, %v1915_v56 }
 0xecf   :  { %3685 = vpow2.f32 %v2982_v33 }
 0xed0   :  { %3687 = vpow2.f32 %v2984_v26 }
 0xed7   :  { %v3682_v27 = vpop.eup %3681 }
 0xed8   :  { %v3684_v28 = vpop.eup %3683  ;;  %1814 = vrot.lane.b32.xlu0 %v3682_v27, %s3795_s20 }
 0xed9   :  { %1925 = vrot.lane.b32.xlu1 %v3684_v28, %s3795_s20  ;;  %v3686_v34 = vpop.eup %3685 }
 0xeda   :  { %v3688_v35 = vpop.eup %3687  ;;  %v1808_v36 = vadd.f32 1.0, %v3686_v34 }
 0xedb   :  { %v1919_v37 = vadd.f32 1.0, %v3688_v35 }
 0xedc   :  { %3689 = vrcp.f32 %v1808_v36 }
 0xedd   :  { %3691 = vrcp.f32 %v1919_v37 }
 0xee6   :  { %v3690_v29 = vpop.eup %3689 }
 0xee7   :  { %v3692_v40 = vpop.eup %3691  ;;  %v1812_v45 = vmul.f32 %v3690_v29, %v4215_v63 }
 0xee8   :  { %v1923_v47 = vmul.f32 %v3692_v40, %v4219_v3 }
 0xf4a   :  { %v1815_v39 = vpop.permute.xlu0 %1814 }
 0xf4b   :  { %v1926_v42 = vpop.permute.xlu1 %1925  ;;  %v1817_v43 = vmul.f32 %v3690_v29, %v1815_v39 }
 0xf4c   :  { %v1928_v14 = vmul.f32 %v3692_v40, %v1926_v42 }
 0xf4d   :  { %1819 = vrot.lane.b32.xlu0 %v1817_v43, %s3796_s4 }
 0xf4e   :  { %1930 = vrot.lane.b32.xlu1 %v1928_v14, %s3796_s4 }
 0xfbf   :  { %v1820_v49 = vpop.permute.xlu0 %1819 }
 0xfc0   :  { %v1931_v50 = vpop.permute.xlu1 %1930  ;;  %v4258_v51 = vadd.f32 %v1820_v49, %v1812_v45 }
 0xfc1   :  { %v4260_v52 = vadd.f32 %v1931_v50, %v1923_v47 }
 0xfc2   :  { %3693 = vtanh.f32 %v4258_v51 }
 0xfc3   :  { %3695 = vtanh.f32 %v4260_v52 }
 0xfcc   :  { %v3694_v53 = vpop.eup %3693 }
 0xfcd   :  { %v3696_v54 = vpop.eup %3695  ;;  %1825 = vrot.lane.b32.xlu0 %v3694_v53, %s3795_s20 }
 0xfce   :  { %1936 = vrot.lane.b32.xlu1 %v3696_v54, %s3795_s20 }
0x103f   :  { %v1826_v48 = vpop.permute.xlu0 %1825 }
0x1040   :  { %v1937_v55 = vpop.permute.xlu1 %1936  ;;  %v1828_v58 = vmul.f32 %v3690_v29, %v1826_v48 }
0x1041   :  { %v1939_v59 = vmul.f32 %v3692_v40, %v1937_v55 }
0x1042   :  { %1831 = vrot.lane.b32.xlu0 %v1828_v58, %s3796_s4 }
0x1043   :  { %2013 = vrot.lane.b32.xlu1 %v1939_v59, %s3796_s4 }
0x10b4   :  { %v4268_v7 = vpop.permute.xlu0 %1831 }
0x10b5   :  { %v2014_v60 = vpop.permute.xlu1 %2013  ;;  %3322 = vmatmul.mubr.msk.f32.vlgmr.msra.gmra.mrb[20].mxu0 %vm424_vm3, %v4268_v7 }
0x10b6   :  { %3333 = vmatmul.mubr.msk.f32.vlgmr.msra.gmra.mrb[20].mxu1 %vm424_vm3, %v2014_v60  ;;  %3554 = vmatpush3.bf16.msra.mxu0 %v3896_v20 }
0x10b7   :  { %3555 = vmatprep.subr.bf16.mxu0 %v3793_v23  ;;  %3343 = vmatprep.mubr.msk.f32.mxu0 %vm3794_vm1, %v3792_v0 }
0x10b8   :  { %3560 = vmatpush3.bf16.msra.mxu1 %v4013_v41  ;;  %3354 = vmatprep.mubr.msk.f32.mxu1 %vm3794_vm1, %v3792_v0 }
0x10b9   :  { %3561 = vmatprep.subr.bf16.mxu1 %v3793_v23 }
0x10ba   :  { %3557 = vmatpush3.bf16.msra.mxu0 %v3902_v24 }
0x10bb   :  { %3564 = vmatprep.subr.bf16.mxu0 %v3793_v23 }
0x10bc   :  { %3563 = vmatpush3.bf16.msra.mxu1 %v4022_v44 }
0x10bd   :  { %3344 = vmatmul.mubr.msk.f32.vlgmr.msra.gmra.mrb[22].mxu0 %vm424_vm3, %v2014_v60  ;;  %3570 = vmatprep.subr.bf16.mxu1 %v3793_v23 }
0x10be   :  { %3566 = vmatpush3.bf16.msra.mxu0 %v3998_v32  ;;  %3365 = vmatprep.mubr.msk.f32.mxu0 %vm3794_vm1, %v3792_v0 }
0x10bf   :  { %3567 = vmatprep.subr.bf16.mxu0 %v3793_v23 }
0x10c2   :  { %3569 = vmatpush3.bf16.msra.mxu0 %v4006_v38 }
0x10c3   :  { %3576 = vmatprep.subr.bf16.mxu0 %v3793_v23 }
0x1188   :  { %v2008_v61 = vpop.f32.mrb[20].mxu0 }
0x1189   :  { %v2083_v63 = vpop.f32.mrb[20].mxu1  ;;  %v3323_v1 = vpop.f32.mrb[21].mxu0 }
0x118a   :  { %v2084_v2 = vadd.f32 %v2083_v63, %v2008_v61  ;;  %v3334_v3 = vpop.f32.mrb[21].mxu1 }
0x118c   :  { %v2087_v4 = vadd.f32 %v4082_v18, %v2084_v2 }
0x118e   :  { %3697 = vtanh.f32 %v2087_v4  ;;  %v2987_v11 = vmul.f32 -1.442695, %v2087_v4 }
0x1190   :  { %v2194_v16 = vpop.f32.mrb[22].mxu0 }
0x1191   :  { %v2198_v5 = vadd.f32 %v2194_v16, %v3957_v57  ;;  %v3345_v6 = vpop.f32.mrb[23].mxu0 }
0x1193   :  { %3699 = vtanh.f32 %v2198_v5  ;;  %v2989_v12 = vmul.f32 -1.442695, %v2198_v5 }
0x1194   :  { %3701 = vpow2.f32 %v2987_v11 }
0x1195   :  { %3703 = vpow2.f32 %v2989_v12 }
0x1198   :  { %v3698_v8 = vpop.eup %3697 }
0x1199   :  { %2097 = vrot.lane.b32.xlu0 %v3698_v8, %s3795_s20 }
0x119d   :  { %v3700_v9 = vpop.eup %3699 }
0x119e   :  { %2208 = vrot.lane.b32.xlu1 %v3700_v9, %s3795_s20  ;;  %v3702_v13 = vpop.eup %3701 }
0x119f   :  { %v2091_v15 = vadd.f32 1.0, %v3702_v13  ;;  %v3704_v19 = vpop.eup %3703 }
0x11a0   :  { %v2202_v30 = vadd.f32 1.0, %v3704_v19 }
0x11a1   :  { %3705 = vrcp.f32 %v2091_v15 }
0x11a2   :  { %3707 = vrcp.f32 %v2202_v30 }
0x11ab   :  { %v3706_v21 = vpop.eup %3705 }
0x11ac   :  { %v3708_v56 = vpop.eup %3707  ;;  %v2095_v28 = vmul.f32 %v3706_v21, %v4258_v51 }
0x11ad   :  { %v2206_v34 = vmul.f32 %v3708_v56, %v4260_v52 }
0x120b   :  { %v2098_v57 = vpop.permute.xlu0 %2097 }
0x120c   :  { %v2100_v22 = vmul.f32 %v3706_v21, %v2098_v57 }
0x120e   :  { %2102 = vrot.lane.b32.xlu0 %v2100_v22, %s3796_s4 }
0x1210   :  { %v2209_v25 = vpop.permute.xlu1 %2208 }
0x1211   :  { %v2211_v27 = vmul.f32 %v3708_v56, %v2209_v25 }
0x1213   :  { %2213 = vrot.lane.b32.xlu1 %v2211_v27, %s3796_s4 }
0x1280   :  { %v2103_v33 = vpop.permute.xlu0 %2102 }
0x1281   :  { %v4299_v26 = vadd.f32 %v2103_v33, %v2095_v28 }
0x1283   :  { %3709 = vtanh.f32 %v4299_v26 }
0x1285   :  { %v2214_v35 = vpop.permute.xlu1 %2213 }
0x1286   :  { %v4303_v36 = vadd.f32 %v2214_v35, %v2206_v34 }
0x1288   :  { %3711 = vtanh.f32 %v4303_v36 }
0x128d   :  { %v3710_v37 = vpop.eup %3709 }
0x128e   :  { %2108 = vrot.lane.b32.xlu0 %v3710_v37, %s3795_s20 }
0x1292   :  { %v3712_v29 = vpop.eup %3711 }
0x1293   :  { %2219 = vrot.lane.b32.xlu1 %v3712_v29, %s3795_s20 }
0x1300   :  { %v2109_v39 = vpop.permute.xlu0 %2108 }
0x1301   :  { %v2111_v40 = vmul.f32 %v3706_v21, %v2109_v39 }
0x1303   :  { %2114 = vrot.lane.b32.xlu0 %v2111_v40, %s3796_s4 }
0x1305   :  { %v2220_v42 = vpop.permute.xlu1 %2219 }
0x1306   :  { %v2222_v43 = vmul.f32 %v3708_v56, %v2220_v42 }
0x1308   :  { %2296 = vrot.lane.b32.xlu1 %v2222_v43, %s3796_s4  ;;  %v2686_v43 = vld [vmem:[%s4451_s5 + $0x8] sm:$0xff] }
0x1375   :  { %v4310_v14 = vpop.permute.xlu0 %2114 }
0x1376   :  { %3355 = vmatmul.mubr.msk.f32.vlgmr.msra.gmra.mrb[22].mxu1 %vm424_vm3, %v4310_v14 }
0x1377   :  { %3572 = vmatpush3.bf16.msra.mxu1 %v3896_v20  ;;  %3376 = vmatprep.mubr.msk.f32.mxu1 %vm3794_vm1, %v3792_v0 }
0x1378   :  { %3573 = vmatprep.subr.bf16.mxu1 %v3793_v23 }
0x137a   :  { %v2297_v45 = vpop.permute.xlu1 %2296 }
0x137b   :  { %3575 = vmatpush3.bf16.msra.mxu1 %v3902_v24  ;;  %3366 = vmatmul.mubr.msk.f32.vlgmr.msra.gmra.mrb[24].mxu0 %vm424_vm3, %v2297_v45 }
0x137c   :  { %3582 = vmatprep.subr.bf16.mxu1 %v3793_v23  ;;  %3578 = vmatpush3.bf16.msra.mxu0 %v4013_v41 }
0x137d   :  { %3579 = vmatprep.subr.bf16.mxu0 %v3793_v23  ;;  %3387 = vmatprep.mubr.msk.f32.mxu0 %vm3794_vm1, %v3792_v0 }
0x137e   :  { %3377 = vmatmul.mubr.msk.f32.vlgmr.msra.gmra.mrb[24].mxu1 %vm424_vm3, %v2297_v45 }
0x137f   :  { %3584 = vmatpush3.bf16.msra.mxu1 %v3998_v32  ;;  %3398 = vmatprep.mubr.msk.f32.mxu1 %vm3794_vm1, %v3792_v0 }
0x1380   :  { %3585 = vmatprep.subr.bf16.mxu1 %v3793_v23  ;;  %3581 = vmatpush3.bf16.msra.mxu0 %v4022_v44 }
0x1381   :  { %3588 = vmatprep.subr.bf16.mxu0 %v3793_v23 }
0x1383   :  { %3587 = vmatpush3.bf16.msra.mxu1 %v4006_v38 }
0x1384   :  { %3412 = vmatprep.subr.mxu1 %v3792_v0 }
0x1449   :  { %v2291_v20 = vpop.f32.mrb[22].mxu1 }
0x144a   :  { %v3356_v24 = vpop.f32.mrb[23].mxu1 }
0x144b   :  { %v2687_v24 = vld [vmem:[%s4451_s5 + $0x10] sm:$0xff] }
0x144e   :  { %v2366_v41 = vpop.f32.mrb[24].mxu0 }
0x144f   :  { %v2367_v47 = vadd.f32 %v2366_v41, %v2291_v20  ;;  %v3367_v49 = vpop.f32.mrb[25].mxu0  ;;  %v2688_v41 = vld [vmem:[%s4451_s5 + $0x18] sm:$0xff] }
0x1450   :  { %v2772_v49 = vld [vmem:[%s4452_s6 + $0x20] sm:$0x7] }
0x1451   :  { %v2370_v32 = vadd.f32 %v4082_v18, %v2367_v47  ;;  %v2477_v50 = vpop.f32.mrb[24].mxu1  ;;  %v3592_v47 = vpack.c.bf16 %v2688_v41, %v2687_v24 }
0x1452   :  { %v2481_v51 = vadd.f32 %v2477_v50, %v4080_v17  ;;  %v3378_v52 = vpop.f32.mrb[25].mxu1  ;;  %v2768_v50 = vld [vmem:[%s4452_s6] sm:$0xff] }
0x1453   :  { %3713 = vtanh.f32 %v2370_v32  ;;  %v2992_v38 = vmul.f32 -1.442695, %v2370_v32  ;;  %v2774_v32 = vld [vmem:[%s4447_s1] sm:$0x3] }
0x1454   :  { %3715 = vtanh.f32 %v2481_v51  ;;  %v2994_v54 = vmul.f32 -1.442695, %v2481_v51  ;;  %v2769_v51 = vld [vmem:[%s4452_s6 + $0x8] sm:$0xff] }
0x1455   :  { %3717 = vpow2.f32 %v2992_v38  ;;  %v3595_v52 = vpack.c.bf16 %v2769_v51, %v2768_v50  ;;  %v980_v38 = vld [vmem:[%s4448_s2 + $0x2] sm:$0x3] }
0x1456   :  { %3719 = vpow2.f32 %v2994_v54  ;;  %v697_v54 = vld [vmem:[%s4448_s2] sm:$0x3] }
0x145d   :  { %v3714_v44 = vpop.eup %3713 }
0x145e   :  { %v3716_v53 = vpop.eup %3715  ;;  %2380 = vrot.lane.b32.xlu0 %v3714_v44, %s3795_s20 }
0x145f   :  { %2491 = vrot.lane.b32.xlu1 %v3716_v53, %s3795_s20  ;;  %v3718_v48 = vpop.eup %3717 }
0x1460   :  { %v3720_v55 = vpop.eup %3719  ;;  %v2374_v58 = vadd.f32 1.0, %v3718_v48  ;;  %v1263_v48 = vld [vmem:[%s4448_s2 + $0x4] sm:$0x3] }
0x1461   :  { %v2485_v59 = vadd.f32 1.0, %v3720_v55  ;;  %v702_v55 = vmul.f32 %v4101_v62, %v697_v54  ;;  %v2395_v62 = vld [vmem:[%s4448_s2 + $0xc] sm:$0x3] }
0x1462   :  { %3721 = vrcp.f32 %v2374_v58  ;;  %v1268_v58 = vmul.f32 %v4184_v31, %v1263_v48 }
0x1463   :  { %3723 = vrcp.f32 %v2485_v59  ;;  %v1829_v59 = vld [vmem:[%s4448_s2 + $0x8] sm:$0x3] }
0x146c   :  { %v3722_v17 = vpop.eup %3721 }
0x146d   :  { %v3724_v61 = vpop.eup %3723  ;;  %v2378_v3 = vmul.f32 %v3722_v17, %v4299_v26 }
0x146e   :  { %v2489_v4 = vmul.f32 %v3724_v61, %v4303_v36 }
0x14d0   :  { %v2381_v60 = vpop.permute.xlu0 %2380 }
0x14d1   :  { %v2492_v63 = vpop.permute.xlu1 %2491  ;;  %v2383_v1 = vmul.f32 %v3722_v17, %v2381_v60 }
0x14d2   :  { %v2494_v2 = vmul.f32 %v3724_v61, %v2492_v63  ;;  %v1834_v63 = vmul.f32 %v4268_v7, %v1829_v59  ;;  %v2770_v7 = vld [vmem:[%s4452_s6 + $0x10] sm:$0xff] }
0x14d3   :  { %2385 = vrot.lane.b32.xlu0 %v2383_v1, %s3796_s4 }
0x14d4   :  { %2496 = vrot.lane.b32.xlu1 %v2494_v2, %s3796_s4 }
0x1545   :  { %v2386_v16 = vpop.permute.xlu0 %2385 }
0x1546   :  { %v2497_v5 = vpop.permute.xlu1 %2496  ;;  %v2388_v6 = vadd.f32 %v2386_v16, %v2378_v3 }
0x1547   :  { %v2499_v8 = vadd.f32 %v2497_v5, %v2489_v4 }
0x1548   :  { %3725 = vtanh.f32 %v2388_v6 }
0x1549   :  { %3727 = vtanh.f32 %v2499_v8 }
0x1552   :  { %v3726_v9 = vpop.eup %3725 }
0x1553   :  { %v3728_v11 = vpop.eup %3727  ;;  %2391 = vrot.lane.b32.xlu0 %v3726_v9, %s3795_s20 }
0x1554   :  { %2502 = vrot.lane.b32.xlu1 %v3728_v11, %s3795_s20 }
0x15c5   :  { %v2392_v12 = vpop.permute.xlu0 %2391 }
0x15c6   :  { %v2503_v13 = vpop.permute.xlu1 %2502  ;;  %v2394_v15 = vmul.f32 %v3722_v17, %v2392_v12 }
0x15c7   :  { %v2505_v19 = vmul.f32 %v3724_v61, %v2503_v13  ;;  %v2112_v61 = vld [vmem:[%s4448_s2 + $0xa] sm:$0x3]  ;;  %v2998_v13 = vld [vmem:[%s4451_s5 + $0x20] ss:$0 sm:$0xff] }
0x15c8   :  { %2397 = vrot.lane.b32.xlu0 %v2394_v15, %s3796_s4  ;;  %v2117_v31 = vmul.f32 %v4310_v14, %v2112_v61  ;;  %v2771_v14 = vld [vmem:[%s4452_s6 + $0x18] sm:$0xff] }
0x15c9   :  { %2579 = vrot.lane.b32.xlu1 %v2505_v19, %s3796_s4  ;;  %v3598_v9 = vpack.c.bf16 %v2771_v14, %v2770_v7 }
0x163a   :  { %v4346_v30 = vpop.permute.xlu0 %2397 }
0x163b   :  { %v2580_v21 = vpop.permute.xlu1 %2579  ;;  %3388 = vmatmul.mubr.msk.f32.vlgmr.msra.gmra.mrb[26].mxu0 %vm424_vm3, %v4346_v30  ;;  %v2400_v3 = vmul.f32 %v4346_v30, %v2395_v62 }
0x163c   :  { %3399 = vmatmul.mubr.msk.f32.vlgmr.msra.gmra.mrb[26].mxu1 %vm424_vm3, %v2580_v21  ;;  %3409 = vmatprep.mubr.msk.f32.mxu0 %vm3794_vm1, %v3792_v0 }
0x163d   :  { %3414 = vmatprep.mubr.msk.f32.mxu1 %vm3794_vm1, %v3792_v0  ;;  %3413 = vmatpush3.msk.msra.mxu1 %vm2779_vm4, %v2772_v49 }
0x163e   :  { %3594 = vmatprep.subr.bf16.mxu1 %v3793_v23 }
0x1640   :  { %3415 = vmatmul.mubr.msk.f32.vlgmr.msra.gmra.mrb[28].mxu1 %vm2775_vm5, %v2774_v32 }
0x1641   :  { %3425 = vmatprep.mubr.msk.f32.mxu1 %vm3794_vm1, %v3792_v0  ;;  %3596 = vmatpush3.bf16.msra.mxu1 %v3595_v52  ;;  %v985_v0 = vmul.f32 %v4142_v46, %v980_v38 }
0x1642   :  { %3597 = vmatprep.subr.bf16.mxu1 %v3793_v23 }
0x1643   :  { %v986_v17 = vadd.f32 %v985_v0, %v702_v55 }
0x1645   :  { %v1269_v46 = vadd.f32 %v1268_v58, %v986_v17  ;;  %3599 = vmatpush3.bf16.msra.mxu1 %v3598_v9 }
0x170e   :  { %v2574_v57 = vpop.f32.mrb[26].mxu0 }
0x170f   :  { %v2649_v22 = vpop.f32.mrb[26].mxu1  ;;  %v3389_v56 = vpop.f32.mrb[27].mxu0 }
0x1710   :  { %v2650_v25 = vadd.f32 %v2649_v22, %v2574_v57  ;;  %v3400_v27 = vpop.f32.mrb[27].mxu1  ;;  %v3003_v57 = vld [vmem:[%s4452_s6 + $0x23] ss:$0 sm:$0xff] }
0x1712   :  { %v2653_v28 = vadd.f32 %v4082_v18, %v2650_v25  ;;  %v2685_v18 = vld [vmem:[%s4451_s5] sm:$0xff]  ;;  %s3797_s5 = smov [#allocation5]  }
0x1713   :  { %v3589_v45 = vpack.c.bf16 %v2686_v43, %v2685_v18  ;;  %v2849_v11 = vpop.f32.mrb[28].mxu1 }
0x1714   :  { %3729 = vtanh.f32 %v2653_v28  ;;  %v2997_v26 = vmul.f32 -1.442695, %v2653_v28  ;;  %v3416_v12 = vpop.f32.mrb[29].mxu1 }
0x1715   :  { %3590 = vmatpush3.bf16.msra.mxu0 %v3589_v45 }
0x1716   :  { %3731 = vpow2.f32 %v2997_v26  ;;  %3591 = vmatprep.subr.bf16.mxu0 %v3793_v23  ;;  %v1546_v23 = vld [vmem:[%s4448_s2 + $0x6] sm:$0x3] }
0x1717   :  { %v1551_v60 = vmul.f32 %v4226_v10, %v1546_v23  ;;  %v2678_v10 = vld [vmem:[%s4448_s2 + $0xe] sm:$0x3] }
0x1719   :  { %3593 = vmatpush3.bf16.msra.mxu0 %v3592_v47  ;;  %v1552_v1 = vadd.f32 %v1551_v60, %v1269_v46 }
0x171b   :  { %v1835_v2 = vadd.f32 %v1834_v63, %v1552_v1 }
0x171d   :  { %v2118_v4 = vadd.f32 %v2117_v31, %v1835_v2 }
0x171e   :  { %v3730_v33 = vpop.eup %3729 }
0x171f   :  { %2663 = vrot.lane.b32.xlu0 %v3730_v33, %s3795_s20  ;;  %v2401_v5 = vadd.f32 %v2400_v3, %v2118_v4 }
0x1720   :  { %v3732_v34 = vpop.eup %3731 }
0x1721   :  { %v2657_v35 = vadd.f32 1.0, %v3732_v34 }
0x1723   :  { %3733 = vrcp.f32 %v2657_v35 }
0x172d   :  { %v3734_v36 = vpop.eup %3733 }
0x172e   :  { %v2661_v39 = vmul.f32 %v3734_v36, %v2388_v6 }
0x1791   :  { %v2664_v37 = vpop.permute.xlu0 %2663 }
0x1792   :  { %v2666_v29 = vmul.f32 %v3734_v36, %v2664_v37 }
0x1794   :  { %2668 = vrot.lane.b32.xlu1 %v2666_v29, %s3796_s4 }
0x1806   :  { %v2669_v40 = vpop.permute.xlu1 %2668 }
0x1807   :  { %v2671_v42 = vadd.f32 %v2669_v40, %v2661_v39 }
0x1809   :  { %3735 = vtanh.f32 %v2671_v42 }
0x1813   :  { %v3736_v20 = vpop.eup %3735 }
0x1814   :  { %2674 = vrot.lane.b32.xlu0 %v3736_v20, %s3795_s20  ;;  %s2944_s20 = sshll.u32 %s3797_s5, 4  ;;  %s2945_s20 = int_to_ptr.vmem [resolvable:$true] %s2944_s20 }
0x1815   :  { %s3763_s10 = scalar_lea.vmem %s2945_s20, 32  ;;  %p3768_p9 = scmp.lt.s32.totalorder %s2945_s20, %s2945_s20 }
0x1816   :  { %p3764_p8 = scmp.ne.s32.totalorder %s2945_s20, %s3763_s10  ;;  %p3769_p10 = scmp.lt.s32.totalorder %s3763_s10, %s3763_s10 }
0x1818   :  { %p3770_p11 = por %p3769_p10, %p3768_p9 }
0x181a   :  { %p3771_p12 = pnand %p3770_p11, %p3764_p8 }
0x1886   :  { %v2675_v44 = vpop.permute.xlu0 %2674 }
0x1887   :  { %v2677_v53 = vmul.f32 %v3734_v36, %v2675_v44 }
0x1889   :  { %2680 = vrot.lane.b32.xlu1 %v2677_v53, %s3796_s4 }
0x18fb   :  { %v2681_v16 = vpop.permute.xlu1 %2680 }
0x18fc   :  { %v2683_v6 = vmul.f32 %v2681_v16, %v2678_v10 }
0x18fe   :  { %v2684_v8 = vadd.f32 %v2683_v6, %v2401_v5 }
0x1900   :  { %3410 = vmatmul.mubr.msk.f32.vlgmr.msra.gmra.mrb[28].mxu0 %vm424_vm3, %v2684_v8 }
0x19d3   :  { %v2763_v15 = vpop.f32.mrb[28].mxu0 }
0x19d4   :  { %v2764_v19 = vadd.f32 %v2998_v13, %v2763_v15  ;;  %v3411_v30 = vpop.f32.mrb[29].mxu0 }
0x19d6   :  { %v2767_v21 = vmax.f32 %v2764_v19, 0.0 }
0x19d8   :  { %3426 = vmatmul.mubr.msk.f32.vlgmr.msra.gmra.mrb[30].mxu1 %vm424_vm3, %v2767_v21 }
0x1aab   :  { %v2922_v22 = vpop.f32.mrb[30].mxu1 }
0x1aac   :  { %v2923_v56 = vadd.f32 %v2922_v22, %v2849_v11  ;;  %v3427_v25 = vpop.f32.mrb[31].mxu1 }
0x1aae   :  { %v2930_v27 = vadd.f32 %v3003_v57, %v2923_v56 }
0x1ab0   :  { %v3004_v28 = vmul.f32 -1.442695, %v2930_v27 }
0x1ab2   :  { %3737 = vpow2.f32 %v3004_v28 }
0x1abc   :  { %v3738_v33 = vpop.eup %3737 }
0x1abd   :  { %v2934_v26 = vadd.f32 1.0, %v3738_v33 }
0x1abf   :  { %3739 = vrcp.f32 %v2934_v26 }
0x1ac9   :  { %v3740_v34 = vpop.eup %3739 }
0x1aca   :  { %2937 = vst [vmem:[#allocation5] sm:$0x3] %v3740_v34 }
0x1acb   :  { %3774 = shalt.err (!%p3771_p12)
}
0x1acc   :  { %s3775_s12 = scalar_lea.hbm %s4453_s7, 32 }
0x1acd   :  { %p3776_p13 = scmp.ne.s32.totalorder %s4453_s7, %s3775_s12  ;;  %p3779_p0 = scmp.lt.u32.totalorder %s3775_s12, %s4453_s7 }
0x1acf   :  { %p3781_p1 = pnand %p3779_p0, %p3776_p13 }
0x1ad1   :  { %3784 = shalt.err (!%p3781_p1)
}
0x1ad2   :  { %2947 = dma.vmem_to_hbm [thread:$0]  %s2945_s20, 32, %s4453_s7, [#allocation4]  }
0x1ad3   :  { %3787 = dma.done.wait [#allocation4], 32  }
0x1ad4   :  { %3788 = vsyncadd [#allocation4], 4294967264 }
0x1ad5   :  { %2951 = vsyncpa [#allocation3], 1 }
0x1ad6   :  { %2952 = vsyncpa [#allocation4], 1 }

</bundles_post_ra>
